<compile_context>
chip_gen: v5e
topology: v5e:2x2
jax: 0.10.0
libtpu: 0.0.40
codegen_flags: <defaults>
</compile_context>

<pallas_src>
import functools

import numpy as np
import jax
import jax.numpy as jnp
from jax import lax
from jax.experimental import pallas as pl
from jax.experimental.pallas import tpu as pltpu


def _vecint_step_kernel(base_ref, vec_ref, field_ref, out_ref, *, D, H, W):
    """One scaling-and-squaring step for one (batch, spatial-tile) grid point.

    base_ref : (3, T)         f32  base voxel coords (d, h, w) of the T output voxels
    vec_ref  : (1, 3, T)      f32  current velocity at the T output voxels
    field_ref: (1, 3, W, DH)  f32  whole field of this batch, transposed so that
                                   field_ref[0, c, w, d*H + h] = vec[c, d, h, w]
    out_ref  : (1, 3, T)      f32  vec + trilinear_sample(vec, base + vec)
    """
    f32 = jnp.float32
    DH = D * H
    T = out_ref.shape[-1]

    vec = vec_ref[0]                       # (3, T)
    pos = base_ref[...] + vec              # (3, T) absolute sample coords (voxel units)

    pos_d = pos[0:1, :]
    pos_h = pos[1:2, :]
    pos_w = pos[2:3, :]

    d0f = jnp.floor(pos_d)
    h0f = jnp.floor(pos_h)
    w0f = jnp.floor(pos_w)
    fd = pos_d - d0f
    fh = pos_h - h0f
    fw = pos_w - w0f
    d0 = d0f.astype(jnp.int32)
    h0 = h0f.astype(jnp.int32)
    w0 = w0f.astype(jnp.int32)

    # ---- slab one-hot with bilinear (d, h) weights folded in: (DH, T) ----
    # slab[s, m] = sum over the 4 (d, h) corners of voxel m of w_d * w_h * in_bounds.
    s_iota = lax.broadcasted_iota(jnp.int32, (DH, T), 0)
    slab = jnp.zeros((DH, T), f32)
    for dd in (0, 1):
        dc = d0 + dd
        wd = fd if dd else (1.0 - fd)
        in_d = (dc >= 0) & (dc < D)
        for dh in (0, 1):
            hc = h0 + dh
            wh = fh if dh else (1.0 - fh)
            in_h = (hc >= 0) & (hc < H)
            wt = wd * wh * (in_d & in_h).astype(f32)        # (1, T), zero-pad masked
            sc = dc * H + hc                                # (1, T) slab index
            slab = slab + jnp.where(s_iota == sc, wt, 0.0)  # broadcast over DH sublanes

    # ---- two-tap linear weights along w: (W, T) ----
    w_iota = lax.broadcasted_iota(jnp.int32, (W, T), 0)
    w1 = w0 + 1
    ww0 = (1.0 - fw) * ((w0 >= 0) & (w0 < W)).astype(f32)
    ww1 = fw * ((w1 >= 0) & (w1 < W)).astype(f32)
    wmat = jnp.where(w_iota == w0, ww0, 0.0) + jnp.where(w_iota == w1, ww1, 0.0)

    # ---- gather + blend per channel: MXU matmul then sublane reduction ----
    sampled = []
    for c in range(3):
        field_c = field_ref[0, c]                                   # (W, DH)
        g = jnp.dot(field_c, slab, preferred_element_type=f32)      # (W, T)
        sampled.append(jnp.sum(g * wmat, axis=0, keepdims=True))    # (1, T)

    out_ref[0] = vec + jnp.concatenate(sampled, axis=0)


def _pick_spatial_tile(N, DH, max_tile=512):
    """Largest multiple of 128 dividing N (<= cap); else the full N (full-block path)."""
    if N % 128 != 0:
        return N
    # Keep the in-kernel (DH, T) slab-weight temporary around <= ~4 MiB of f32.
    cap = max(128, min(max_tile, ((1 << 20) // max(DH, 1)) // 128 * 128))
    best = 128
    cand = 256
    while cand <= min(N, cap):
        if N % cand == 0:
            best = cand
        cand += 128
    return best


@functools.partial(jax.jit, static_argnums=(1,))
def vecint_pallas(vec, nsteps):
    """VecInt forward. vec: (B, 3, D, H, W) float32."""
    B, C, D, H, W = vec.shape
    assert C == 3, "velocity field must have 3 channels for a 3D volume"
    N = D * H * W
    DH = D * H
    T = _pick_spatial_tile(N, DH)
    num_tiles = N // T

    v = (vec.astype(jnp.float32) * (1.0 / 2 ** nsteps)).reshape(B, 3, N)

    # Base voxel coordinates (the SpatialTransformer "grid" buffer), computed once.
    gd, gh, gw = jnp.meshgrid(
        jnp.arange(D, dtype=jnp.float32),
        jnp.arange(H, dtype=jnp.float32),
        jnp.arange(W, dtype=jnp.float32),
        indexing="ij",
    )
    base = jnp.stack([gd, gh, gw], axis=0).reshape(3, N)

    # VMEM budget: double-buffered resident field + lane-dense tiles + (DH,T)/(W,T) temps.
    # Capped at 48 MiB so it is valid on v7x (64 MiB physical VMEM per TensorCore).
    est = 4 * (2 * 3 * N + 6 * 3 * T + 6 * DH * T + 4 * W * T)
    vmem_limit = int(min(max(2 * est, 32 * 1024 * 1024), 48 * 1024 * 1024))

    kernel = functools.partial(_vecint_step_kernel, D=D, H=H, W=W)
    step = pl.pallas_call(
        kernel,
        out_shape=jax.ShapeDtypeStruct((B, 3, N), jnp.float32),
        grid=(B, num_tiles),
        in_specs=[
            pl.BlockSpec((3, T), lambda b, t: (0, t)),               # base coords tile
            pl.BlockSpec((1, 3, T), lambda b, t: (b, 0, t)),         # velocity tile
            pl.BlockSpec((1, 3, W, DH), lambda b, t: (b, 0, 0, 0)),  # resident field
        ],
        out_specs=pl.BlockSpec((1, 3, T), lambda b, t: (b, 0, t)),
        compiler_params=pltpu.CompilerParams(
            dimension_semantics=("parallel", "parallel"),
            vmem_limit_bytes=vmem_limit,
        ),
    )

    # Each step depends on the whole updated field, so the loop stays at the launch level;
    # the slab-major (W, DH) layout is regenerated between steps with a cheap transpose.
    for _ in range(nsteps):
        v_t = jnp.swapaxes(v.reshape(B, 3, DH, W), -1, -2)   # (B, 3, W, DH)
        v = step(base, v, v_t)
    return v.reshape(B, 3, D, H, W)


@functools.partial(jax.jit, static_argnums=(1,))
def vecint_reference(vec, nsteps):
    """Pure-JAX reference with the same math (explicit 8-corner trilinear gather)."""
    B, C, D, H, W = vec.shape
    N = D * H * W
    HW = H * W
    v = (vec.astype(jnp.float32) * (1.0 / (2 ** nsteps))).reshape(B, 3, N)

    lin = jnp.arange(N, dtype=jnp.int32)
    d_base = (lin // HW).astype(jnp.float32)
    h_base = ((lin // W) % H).astype(jnp.float32)
    w_base = (lin % W).astype(jnp.float32)

    def step(v):
        pos_d = d_base[None, :] + v[:, 0, :]
        pos_h = h_base[None, :] + v[:, 1, :]
        pos_w = w_base[None, :] + v[:, 2, :]
        d0 = jnp.floor(pos_d); fd = pos_d - d0; d0 = d0.astype(jnp.int32)
        h0 = jnp.floor(pos_h); fh = pos_h - h0; h0 = h0.astype(jnp.int32)
        w0 = jnp.floor(pos_w); fw = pos_w - w0; w0 = w0.astype(jnp.int32)
        acc = jnp.zeros_like(v)
        for dd in (0, 1):
            dc = d0 + dd
            wd = fd if dd else (1.0 - fd)
            in_d = (dc >= 0) & (dc < D)
            for dh in (0, 1):
                hc = h0 + dh
                wh = fh if dh else (1.0 - fh)
                in_h = (hc >= 0) & (hc < H)
                for dw in (0, 1):
                    wc = w0 + dw
                    ww = fw if dw else (1.0 - fw)
                    in_w = (wc >= 0) & (wc < W)
                    weight = wd * wh * ww * (in_d & in_h & in_w).astype(jnp.float32)
                    idx = jnp.clip(dc * HW + hc * W + wc, 0, N - 1)
                    idx_b = jnp.broadcast_to(idx[:, None, :], (B, 3, N))
                    gathered = jnp.take_along_axis(v, idx_b, axis=2)
                    acc = acc + gathered * weight[:, None, :]
        return v + acc

    for _ in range(nsteps):
        v = step(v)
    return v.reshape(B, 3, D, H, W)


if __name__ == "__main__":
    key0, key1 = jax.random.split(jax.random.PRNGKey(0))

    # Primary test.
    B, D, H, W = 2, 8, 8, 16
    nsteps = 4
    vec = jax.random.normal(key0, (B, 3, D, H, W), dtype=jnp.float32) * 1.5
    out = jax.block_until_ready(vecint_pallas(vec, nsteps))
    ref = vecint_reference(vec, nsteps)
    np.testing.assert_allclose(np.asarray(out), np.asarray(ref), rtol=1e-4, atol=1e-4)

    # Non-cubic volume (D != H != W) to pin down the channel->axis convention and the
    # transposed slab-major layout; exercises the full-array (non-128-aligned) block path.
    vec2 = jax.random.normal(key1, (1, 3, 4, 6, 10), dtype=jnp.float32) * 2.0
    out2 = jax.block_until_ready(vecint_pallas(vec2, 3))
    ref2 = vecint_reference(vec2, 3)
    np.testing.assert_allclose(np.asarray(out2), np.asarray(ref2), rtol=1e-4, atol=1e-4)

    print("KERNEL_OK")
</pallas_src>

<mosaic_0001>
module attributes {stable_mosaic.version = 11 : i64} {
  func.func @_vecint_step_kernel(%arg0: i32, %arg1: i32, %arg2: memref<3x512xf32, #tpu.memory_space<vmem>>, %arg3: memref<1x3x512xf32, #tpu.memory_space<vmem>>, %arg4: memref<1x3x16x64xf32, #tpu.memory_space<vmem>>, %arg5: memref<1x3x512xf32, #tpu.memory_space<vmem>>) attributes {dimension_semantics = [#tpu.dimension_semantics<parallel>, #tpu.dimension_semantics<parallel>], iteration_bounds = array<i64: 2, 2>, scalar_prefetch = 0 : i64, scratch_operands = 0 : i64, tpu.core_type = #tpu.core_type<tc>, window_params = [{transform_indices = @transform_0, window_bounds = array<i64: 3, 512>}, {transform_indices = @transform_1, window_bounds = array<i64: 1, 3, 512>}, {transform_indices = @transform_2, window_bounds = array<i64: 1, 3, 16, 64>}, {transform_indices = @transform_3, window_bounds = array<i64: 1, 3, 512>}]} {
    %c0 = arith.constant 0 : index
    %c0_0 = arith.constant 0 : index
    %c0_1 = arith.constant 0 : index
    %0 = vector.load %arg3[%c0, %c0_0, %c0_1] : memref<1x3x512xf32, #tpu.memory_space<vmem>>, vector<1x3x512xf32>
    %1 = vector.shape_cast %0 : vector<1x3x512xf32> to vector<3x512xf32>
    %c0_2 = arith.constant 0 : index
    %c0_3 = arith.constant 0 : index
    %2 = vector.load %arg2[%c0_2, %c0_3] : memref<3x512xf32, #tpu.memory_space<vmem>>, vector<3x512xf32>
    %3 = arith.addf %2, %1 : vector<3x512xf32>
    %4 = vector.extract_strided_slice %3 {offsets = [0, 0], sizes = [1, 512], strides = [1, 1]} : vector<3x512xf32> to vector<1x512xf32>
    %5 = vector.extract_strided_slice %3 {offsets = [1, 0], sizes = [1, 512], strides = [1, 1]} : vector<3x512xf32> to vector<1x512xf32>
    %6 = vector.extract_strided_slice %3 {offsets = [2, 0], sizes = [1, 512], strides = [1, 1]} : vector<3x512xf32> to vector<1x512xf32>
    %7 = math.floor %4 : vector<1x512xf32>
    %8 = math.floor %5 : vector<1x512xf32>
    %9 = math.floor %6 : vector<1x512xf32>
    %10 = arith.subf %4, %7 : vector<1x512xf32>
    %11 = arith.subf %5, %8 : vector<1x512xf32>
    %12 = arith.subf %6, %9 : vector<1x512xf32>
    %13 = arith.fptosi %7 : vector<1x512xf32> to vector<1x512xi32>
    %14 = arith.fptosi %8 : vector<1x512xf32> to vector<1x512xi32>
    %15 = arith.fptosi %9 : vector<1x512xf32> to vector<1x512xi32>
    %16 = tpu.iota {dimensions = array<i32: 0>} : vector<64x512xi32>
    %cst = arith.constant 0.000000e+00 : f32
    %17 = vector.broadcast %cst : f32 to vector<64x512xf32>
    %c0_i32 = arith.constant 0 : i32
    %18 = vector.broadcast %c0_i32 : i32 to vector<1x512xi32>
    %19 = arith.addi %13, %18 : vector<1x512xi32>
    %cst_4 = arith.constant 1.000000e+00 : f32
    %20 = vector.broadcast %cst_4 : f32 to vector<1x512xf32>
    %21 = arith.subf %20, %10 : vector<1x512xf32>
    %c0_i32_5 = arith.constant 0 : i32
    %22 = vector.broadcast %c0_i32_5 : i32 to vector<1x512xi32>
    %23 = arith.cmpi sge, %19, %22 : vector<1x512xi32>
    %c8_i32 = arith.constant 8 : i32
    %24 = vector.broadcast %c8_i32 : i32 to vector<1x512xi32>
    %25 = arith.cmpi slt, %19, %24 : vector<1x512xi32>
    %26 = arith.andi %23, %25 : vector<1x512xi1>
    %c0_i32_6 = arith.constant 0 : i32
    %27 = vector.broadcast %c0_i32_6 : i32 to vector<1x512xi32>
    %28 = arith.addi %14, %27 : vector<1x512xi32>
    %cst_7 = arith.constant 1.000000e+00 : f32
    %29 = vector.broadcast %cst_7 : f32 to vector<1x512xf32>
    %30 = arith.subf %29, %11 : vector<1x512xf32>
    %c0_i32_8 = arith.constant 0 : i32
    %31 = vector.broadcast %c0_i32_8 : i32 to vector<1x512xi32>
    %32 = arith.cmpi sge, %28, %31 : vector<1x512xi32>
    %c8_i32_9 = arith.constant 8 : i32
    %33 = vector.broadcast %c8_i32_9 : i32 to vector<1x512xi32>
    %34 = arith.cmpi slt, %28, %33 : vector<1x512xi32>
    %35 = arith.andi %32, %34 : vector<1x512xi1>
    %36 = arith.mulf %21, %30 : vector<1x512xf32>
    %37 = arith.andi %26, %35 : vector<1x512xi1>
    %38 = arith.extui %37 : vector<1x512xi1> to vector<1x512xi32>
    %39 = arith.sitofp %38 : vector<1x512xi32> to vector<1x512xf32>
    %40 = arith.mulf %36, %39 : vector<1x512xf32>
    %c8_i32_10 = arith.constant 8 : i32
    %41 = vector.broadcast %c8_i32_10 : i32 to vector<1x512xi32>
    %42 = arith.muli %19, %41 : vector<1x512xi32>
    %43 = arith.addi %42, %28 : vector<1x512xi32>
    %44 = vector.broadcast %43 : vector<1x512xi32> to vector<64x512xi32>
    %45 = arith.cmpi eq, %16, %44 : vector<64x512xi32>
    %cst_11 = arith.constant 0.000000e+00 : f32
    %46 = vector.shape_cast %40 : vector<1x512xf32> to vector<1x512xf32>
    %47 = vector.broadcast %46 : vector<1x512xf32> to vector<64x512xf32>
    %48 = vector.broadcast %cst_11 : f32 to vector<64x512xf32>
    %49 = arith.select %45, %47, %48 : vector<64x512xi1>, vector<64x512xf32>
    %50 = arith.addf %17, %49 : vector<64x512xf32>
    %c1_i32 = arith.constant 1 : i32
    %51 = vector.broadcast %c1_i32 : i32 to vector<1x512xi32>
    %52 = arith.addi %14, %51 : vector<1x512xi32>
    %c0_i32_12 = arith.constant 0 : i32
    %53 = vector.broadcast %c0_i32_12 : i32 to vector<1x512xi32>
    %54 = arith.cmpi sge, %52, %53 : vector<1x512xi32>
    %c8_i32_13 = arith.constant 8 : i32
    %55 = vector.broadcast %c8_i32_13 : i32 to vector<1x512xi32>
    %56 = arith.cmpi slt, %52, %55 : vector<1x512xi32>
    %57 = arith.andi %54, %56 : vector<1x512xi1>
    %58 = arith.mulf %21, %11 : vector<1x512xf32>
    %59 = arith.andi %26, %57 : vector<1x512xi1>
    %60 = arith.extui %59 : vector<1x512xi1> to vector<1x512xi32>
    %61 = arith.sitofp %60 : vector<1x512xi32> to vector<1x512xf32>
    %62 = arith.mulf %58, %61 : vector<1x512xf32>
    %c8_i32_14 = arith.constant 8 : i32
    %63 = vector.broadcast %c8_i32_14 : i32 to vector<1x512xi32>
    %64 = arith.muli %19, %63 : vector<1x512xi32>
    %65 = arith.addi %64, %52 : vector<1x512xi32>
    %66 = vector.broadcast %65 : vector<1x512xi32> to vector<64x512xi32>
    %67 = arith.cmpi eq, %16, %66 : vector<64x512xi32>
    %cst_15 = arith.constant 0.000000e+00 : f32
    %68 = vector.shape_cast %62 : vector<1x512xf32> to vector<1x512xf32>
    %69 = vector.broadcast %68 : vector<1x512xf32> to vector<64x512xf32>
    %70 = vector.broadcast %cst_15 : f32 to vector<64x512xf32>
    %71 = arith.select %67, %69, %70 : vector<64x512xi1>, vector<64x512xf32>
    %72 = arith.addf %50, %71 : vector<64x512xf32>
    %c1_i32_16 = arith.constant 1 : i32
    %73 = vector.broadcast %c1_i32_16 : i32 to vector<1x512xi32>
    %74 = arith.addi %13, %73 : vector<1x512xi32>
    %c0_i32_17 = arith.constant 0 : i32
    %75 = vector.broadcast %c0_i32_17 : i32 to vector<1x512xi32>
    %76 = arith.cmpi sge, %74, %75 : vector<1x512xi32>
    %c8_i32_18 = arith.constant 8 : i32
    %77 = vector.broadcast %c8_i32_18 : i32 to vector<1x512xi32>
    %78 = arith.cmpi slt, %74, %77 : vector<1x512xi32>
    %79 = arith.andi %76, %78 : vector<1x512xi1>
    %c0_i32_19 = arith.constant 0 : i32
    %80 = vector.broadcast %c0_i32_19 : i32 to vector<1x512xi32>
    %81 = arith.addi %14, %80 : vector<1x512xi32>
    %cst_20 = arith.constant 1.000000e+00 : f32
    %82 = vector.broadcast %cst_20 : f32 to vector<1x512xf32>
    %83 = arith.subf %82, %11 : vector<1x512xf32>
    %c0_i32_21 = arith.constant 0 : i32
    %84 = vector.broadcast %c0_i32_21 : i32 to vector<1x512xi32>
    %85 = arith.cmpi sge, %81, %84 : vector<1x512xi32>
    %c8_i32_22 = arith.constant 8 : i32
    %86 = vector.broadcast %c8_i32_22 : i32 to vector<1x512xi32>
    %87 = arith.cmpi slt, %81, %86 : vector<1x512xi32>
    %88 = arith.andi %85, %87 : vector<1x512xi1>
    %89 = arith.mulf %10, %83 : vector<1x512xf32>
    %90 = arith.andi %79, %88 : vector<1x512xi1>
    %91 = arith.extui %90 : vector<1x512xi1> to vector<1x512xi32>
    %92 = arith.sitofp %91 : vector<1x512xi32> to vector<1x512xf32>
    %93 = arith.mulf %89, %92 : vector<1x512xf32>
    %c8_i32_23 = arith.constant 8 : i32
    %94 = vector.broadcast %c8_i32_23 : i32 to vector<1x512xi32>
    %95 = arith.muli %74, %94 : vector<1x512xi32>
    %96 = arith.addi %95, %81 : vector<1x512xi32>
    %97 = vector.broadcast %96 : vector<1x512xi32> to vector<64x512xi32>
    %98 = arith.cmpi eq, %16, %97 : vector<64x512xi32>
    %cst_24 = arith.constant 0.000000e+00 : f32
    %99 = vector.shape_cast %93 : vector<1x512xf32> to vector<1x512xf32>
    %100 = vector.broadcast %99 : vector<1x512xf32> to vector<64x512xf32>
    %101 = vector.broadcast %cst_24 : f32 to vector<64x512xf32>
    %102 = arith.select %98, %100, %101 : vector<64x512xi1>, vector<64x512xf32>
    %103 = arith.addf %72, %102 : vector<64x512xf32>
    %c1_i32_25 = arith.constant 1 : i32
    %104 = vector.broadcast %c1_i32_25 : i32 to vector<1x512xi32>
    %105 = arith.addi %14, %104 : vector<1x512xi32>
    %c0_i32_26 = arith.constant 0 : i32
    %106 = vector.broadcast %c0_i32_26 : i32 to vector<1x512xi32>
    %107 = arith.cmpi sge, %105, %106 : vector<1x512xi32>
    %c8_i32_27 = arith.constant 8 : i32
    %108 = vector.broadcast %c8_i32_27 : i32 to vector<1x512xi32>
    %109 = arith.cmpi slt, %105, %108 : vector<1x512xi32>
    %110 = arith.andi %107, %109 : vector<1x512xi1>
    %111 = arith.mulf %10, %11 : vector<1x512xf32>
    %112 = arith.andi %79, %110 : vector<1x512xi1>
    %113 = arith.extui %112 : vector<1x512xi1> to vector<1x512xi32>
    %114 = arith.sitofp %113 : vector<1x512xi32> to vector<1x512xf32>
    %115 = arith.mulf %111, %114 : vector<1x512xf32>
    %c8_i32_28 = arith.constant 8 : i32
    %116 = vector.broadcast %c8_i32_28 : i32 to vector<1x512xi32>
    %117 = arith.muli %74, %116 : vector<1x512xi32>
    %118 = arith.addi %117, %105 : vector<1x512xi32>
    %119 = vector.broadcast %118 : vector<1x512xi32> to vector<64x512xi32>
    %120 = arith.cmpi eq, %16, %119 : vector<64x512xi32>
    %cst_29 = arith.constant 0.000000e+00 : f32
    %121 = vector.shape_cast %115 : vector<1x512xf32> to vector<1x512xf32>
    %122 = vector.broadcast %121 : vector<1x512xf32> to vector<64x512xf32>
    %123 = vector.broadcast %cst_29 : f32 to vector<64x512xf32>
    %124 = arith.select %120, %122, %123 : vector<64x512xi1>, vector<64x512xf32>
    %125 = arith.addf %103, %124 : vector<64x512xf32>
    %126 = tpu.iota {dimensions = array<i32: 0>} : vector<16x512xi32>
    %c1_i32_30 = arith.constant 1 : i32
    %127 = vector.broadcast %c1_i32_30 : i32 to vector<1x512xi32>
    %128 = arith.addi %15, %127 : vector<1x512xi32>
    %cst_31 = arith.constant 1.000000e+00 : f32
    %129 = vector.broadcast %cst_31 : f32 to vector<1x512xf32>
    %130 = arith.subf %129, %12 : vector<1x512xf32>
    %c0_i32_32 = arith.constant 0 : i32
    %131 = vector.broadcast %c0_i32_32 : i32 to vector<1x512xi32>
    %132 = arith.cmpi sge, %15, %131 : vector<1x512xi32>
    %c16_i32 = arith.constant 16 : i32
    %133 = vector.broadcast %c16_i32 : i32 to vector<1x512xi32>
    %134 = arith.cmpi slt, %15, %133 : vector<1x512xi32>
    %135 = arith.andi %132, %134 : vector<1x512xi1>
    %136 = arith.extui %135 : vector<1x512xi1> to vector<1x512xi32>
    %137 = arith.sitofp %136 : vector<1x512xi32> to vector<1x512xf32>
    %138 = arith.mulf %130, %137 : vector<1x512xf32>
    %c0_i32_33 = arith.constant 0 : i32
    %139 = vector.broadcast %c0_i32_33 : i32 to vector<1x512xi32>
    %140 = arith.cmpi sge, %128, %139 : vector<1x512xi32>
    %c16_i32_34 = arith.constant 16 : i32
    %141 = vector.broadcast %c16_i32_34 : i32 to vector<1x512xi32>
    %142 = arith.cmpi slt, %128, %141 : vector<1x512xi32>
    %143 = arith.andi %140, %142 : vector<1x512xi1>
    %144 = arith.extui %143 : vector<1x512xi1> to vector<1x512xi32>
    %145 = arith.sitofp %144 : vector<1x512xi32> to vector<1x512xf32>
    %146 = arith.mulf %12, %145 : vector<1x512xf32>
    %147 = vector.broadcast %15 : vector<1x512xi32> to vector<16x512xi32>
    %148 = arith.cmpi eq, %126, %147 : vector<16x512xi32>
    %cst_35 = arith.constant 0.000000e+00 : f32
    %149 = vector.shape_cast %138 : vector<1x512xf32> to vector<1x512xf32>
    %150 = vector.broadcast %149 : vector<1x512xf32> to vector<16x512xf32>
    %151 = vector.broadcast %cst_35 : f32 to vector<16x512xf32>
    %152 = arith.select %148, %150, %151 : vector<16x512xi1>, vector<16x512xf32>
    %153 = vector.broadcast %128 : vector<1x512xi32> to vector<16x512xi32>
    %154 = arith.cmpi eq, %126, %153 : vector<16x512xi32>
    %cst_36 = arith.constant 0.000000e+00 : f32
    %155 = vector.shape_cast %146 : vector<1x512xf32> to vector<1x512xf32>
    %156 = vector.broadcast %155 : vector<1x512xf32> to vector<16x512xf32>
    %157 = vector.broadcast %cst_36 : f32 to vector<16x512xf32>
    %158 = arith.select %154, %156, %157 : vector<16x512xi1>, vector<16x512xf32>
    %159 = arith.addf %152, %158 : vector<16x512xf32>
    %c0_37 = arith.constant 0 : index
    %c0_38 = arith.constant 0 : index
    %c0_39 = arith.constant 0 : index
    %c0_40 = arith.constant 0 : index
    %160 = vector.load %arg4[%c0_37, %c0_38, %c0_39, %c0_40] : memref<1x3x16x64xf32, #tpu.memory_space<vmem>>, vector<1x1x16x64xf32>
    %161 = vector.shape_cast %160 : vector<1x1x16x64xf32> to vector<16x64xf32>
    %cst_41 = arith.constant dense<0.000000e+00> : vector<16x512xf32>
    %162 = tpu.matmul %161, %125, %cst_41 {dimension_numbers = #tpu.dot_dimension_numbers<[1], [0], [0], [1], [0, 0, 1, 1], [], []>} : vector<16x64xf32>, vector<64x512xf32>, vector<16x512xf32> -> vector<16x512xf32>
    %163 = arith.mulf %162, %159 : vector<16x512xf32>
    %cst_42 = arith.constant dense<0.000000e+00> : vector<512xf32>
    %164 = vector.multi_reduction <add>, %163, %cst_42 [0] : vector<16x512xf32> to vector<512xf32>
    %165 = vector.shape_cast %164 : vector<512xf32> to vector<1x512xf32>
    %c0_43 = arith.constant 0 : index
    %c1 = arith.constant 1 : index
    %c0_44 = arith.constant 0 : index
    %c0_45 = arith.constant 0 : index
    %166 = vector.load %arg4[%c0_43, %c1, %c0_44, %c0_45] : memref<1x3x16x64xf32, #tpu.memory_space<vmem>>, vector<1x1x16x64xf32>
    %167 = vector.shape_cast %166 : vector<1x1x16x64xf32> to vector<16x64xf32>
    %cst_46 = arith.constant dense<0.000000e+00> : vector<16x512xf32>
    %168 = tpu.matmul %167, %125, %cst_46 {dimension_numbers = #tpu.dot_dimension_numbers<[1], [0], [0], [1], [0, 0, 1, 1], [], []>} : vector<16x64xf32>, vector<64x512xf32>, vector<16x512xf32> -> vector<16x512xf32>
    %169 = arith.mulf %168, %159 : vector<16x512xf32>
    %cst_47 = arith.constant dense<0.000000e+00> : vector<512xf32>
    %170 = vector.multi_reduction <add>, %169, %cst_47 [0] : vector<16x512xf32> to vector<512xf32>
    %171 = vector.shape_cast %170 : vector<512xf32> to vector<1x512xf32>
    %c0_48 = arith.constant 0 : index
    %c2 = arith.constant 2 : index
    %c0_49 = arith.constant 0 : index
    %c0_50 = arith.constant 0 : index
    %172 = vector.load %arg4[%c0_48, %c2, %c0_49, %c0_50] : memref<1x3x16x64xf32, #tpu.memory_space<vmem>>, vector<1x1x16x64xf32>
    %173 = vector.shape_cast %172 : vector<1x1x16x64xf32> to vector<16x64xf32>
    %cst_51 = arith.constant dense<0.000000e+00> : vector<16x512xf32>
    %174 = tpu.matmul %173, %125, %cst_51 {dimension_numbers = #tpu.dot_dimension_numbers<[1], [0], [0], [1], [0, 0, 1, 1], [], []>} : vector<16x64xf32>, vector<64x512xf32>, vector<16x512xf32> -> vector<16x512xf32>
    %175 = arith.mulf %174, %159 : vector<16x512xf32>
    %cst_52 = arith.constant dense<0.000000e+00> : vector<512xf32>
    %176 = vector.multi_reduction <add>, %175, %cst_52 [0] : vector<16x512xf32> to vector<512xf32>
    %177 = vector.shape_cast %176 : vector<512xf32> to vector<1x512xf32>
    %178 = tpu.concatenate %165, %171, %177 in 0 : vector<1x512xf32>, vector<1x512xf32>, vector<1x512xf32> -> vector<3x512xf32>
    %179 = arith.addf %1, %178 : vector<3x512xf32>
    %c0_53 = arith.constant 0 : index
    %c0_54 = arith.constant 0 : index
    %c0_55 = arith.constant 0 : index
    %180 = vector.load %arg5[%c0_53, %c0_54, %c0_55] : memref<1x3x512xf32, #tpu.memory_space<vmem>>, vector<1x3x512xf32>
    %181 = vector.shape_cast %180 : vector<1x3x512xf32> to vector<3x512xf32>
    %182 = vector.shape_cast %179 : vector<3x512xf32> to vector<1x3x512xf32>
    tpu.vector_store %arg5[%c0_53, %c0_54, %c0_55], %182 {strides = array<i32>} : memref<1x3x512xf32, #tpu.memory_space<vmem>>, vector<1x3x512xf32>,
    return
  }
  func.func @transform_0(%arg0: i32, %arg1: i32) -> (i32, i32) {
    %c0_i32 = arith.constant 0 : i32
    %c0_i32_0 = arith.constant 0 : i32
    return %c0_i32, %arg1 : i32, i32
  }
  func.func @transform_1(%arg0: i32, %arg1: i32) -> (i32, i32, i32) {
    %c0_i32 = arith.constant 0 : i32
    %c0_i32_0 = arith.constant 0 : i32
    return %arg0, %c0_i32, %arg1 : i32, i32, i32
  }
  func.func @transform_2(%arg0: i32, %arg1: i32) -> (i32, i32, i32, i32) {
    %c0_i32 = arith.constant 0 : i32
    %c0_i32_0 = arith.constant 0 : i32
    %c0_i32_1 = arith.constant 0 : i32
    %c0_i32_2 = arith.constant 0 : i32
    return %arg0, %c0_i32, %c0_i32_0, %c0_i32_1 : i32, i32, i32, i32
  }
  func.func @transform_3(%arg0: i32, %arg1: i32) -> (i32, i32, i32) {
    %c0_i32 = arith.constant 0 : i32
    %c0_i32_0 = arith.constant 0 : i32
    return %arg0, %c0_i32, %arg1 : i32, i32, i32
  }
}

</mosaic_0001>

<bundles_post_ra>
// kernel: vecint_pallas.4
= control target key start
LH: loop header
LB: loop body
LE: loop exit
PB: predicated region body
PF: predicated region fallthrough
CT: control target
= control target key end

     0   :  { %s1678_s12 = smov 0   ;;  %s1680_s13 = smov 0   ;;  %s2681_s0 = inlined_call_operand.vmem [shape: f32[3,1024], index: 0, kind: input, shape index: {}]   ;;  %s2682_s1 = inlined_call_operand.vmem [shape: f32[2,3,1024], index: 1, kind: input, shape index: {}]   ;;  %s2683_s2 = inlined_call_operand.vmem [shape: f32[2,3,16,64], index: 2, kind: input, shape index: {}]   ;;  %s2684_s3 = inlined_call_operand.vmem [shape: f32[2,3,1024], index: 3, kind: output, shape index: {}]  }
   0x1   :  { %s1682_s14 = smov 0   ;;  %s1684_s15 = smov 0  }
   0x2   :  { %s1686_s16 = smov 0  }
   0x3 LB: > { %s22_s17 = sadd.s32 1, %s1646_s14  ;;  %s25_s18 = sadd.s32 1, %s1650_s15  ;;  %s1654_s16 = sphi %s1686_s16, %s13_s16   ;;  %s1650_s15 = sphi %s1684_s15, %s2763_s15   ;;  %s1646_s14 = sphi %s1682_s14, %s2762_s14   ;;  %s1642_s13 = sphi %s1680_s13, %s2761_s13   ;;  %s1638_s12 = sphi %s1678_s12, %s2760_s12  }
   0x4   : > { %p23_p0 = scmp.ge.s32.totalorder %s22_s17, 2  ;;  %p1511_p1 = scmp.ge.s32.totalorder %s1654_s16, 1 }
   0x5   : > { %p179_p2 = scmp.lt.s32.totalorder %s1654_s16, 5 }
   0x6   : > { %s2765_s17 = smov (%p23_p0, %s22_s17), 0  ;;  %s2767_s18 = smov (!%p23_p0, %s25_s18), %s1650_s15 }
   0x7   : > { %p180_p3 = pnand %p1511_p1, %p179_p2  ;;  %p27_p4 = scmp.ge.s32.totalorder %s2767_s18, 2 }
   0x9   : > { %s2769_s18 = smov (%p27_p4, %s2767_s18), 0  ;;  %183 = sbr.rel (%p180_p3) target bundleno = 357 (0x165), region = 32 }
   0xe   : > { %s1512_s19 = sshll.u32 %s1638_s12, 2  ;;  %p228_p5 = scmp.lt.s32.totalorder %s1642_s13, 1  ;;  %v264_v5 = vlaneseq  ;;  %v1656_v22 = vmov 0   ;;  %v2685_v40 = vmov 0.0  }
   0xf   : > { %p222_p6 = scmp.lt.s32.totalorder %s1512_s19, 7 }
  0x10   : > { %s2771_s13 = smov (!%p228_p5, %s1642_s13), 1  ;;  %v1730_v11 = vshrl.u32 %v264_v5, 7 }
  0x11   : > { %s2773_s19 = smov (!%p222_p6, %s1512_s19), 7  ;;  %s1515_s20 = sshll.u32 %s2771_s13, 3 }
  0x12   : > { %s1513_s21 = sshll.u32 %s2773_s19, 2  ;;  %s1711_s22 = sadd.s32 %s1515_s20, %s2773_s19  ;;  %v1755_v20 = vadd.s32 56, %v1730_v11 }
  0x13   : > { %s225_s25 = scalar_lea.vmem %s2681_s0, %s1513_s21  ;;  %s1516_s26 = sshll.u32 %s1711_s22, 2 }
  0x14   : > { %s1722_s29 = scalar_lea.vmem %s2682_s1, %s1516_s26  ;;  %v254_v0 = vld [vmem:[%s225_s25] sm:$0x77]  ;;  %v255_v1 = vld [vmem:[%s225_s25 + $0x8] sm:$0x77]  ;;  %s1567_s30 = smul.u32 48, %s2771_s13 }
  0x15   : > { %v252_v2 = vld [vmem:[%s1722_s29] sm:$0x77]  ;;  %v253_v3 = vld [vmem:[%s1722_s29 + $0x8] sm:$0x77]  ;;  %s250_s9 = scalar_lea.vmem %s2684_s3, %s1516_s26 }
  0x16   : > { %v256_v4 = vadd.f32 %v254_v0, %v252_v2  ;;  %v257_v6 = vadd.f32 %v255_v1, %v253_v3  ;;  %s2405_s6 = scalar_lea.vmem %s2683_s2, %s1567_s30 }
  0x18   : > { %v258_v7 = vfloor.f32 %v256_v4  ;;  %v259_v8 = vfloor.f32 %v257_v6 }
  0x1a   : > { %v1726_v9 = vsub.f32 %v256_v4, %v258_v7  ;;  %v1728_v10 = vcvt.f32.s32 %v258_v7  ;;  %v1732_v12 = vsub.f32 %v257_v6, %v259_v8  ;;  %v1761_v24 = vcvt.f32.s32 %v259_v8 }
  0x1c   : > { %2713 = vst [vmem:[#allocation2_spill] sm:$0xff] %v1726_v9  ;;  %v1735_v13 = vsub.f32 1.0, %v1726_v9  ;;  %vm275_vm0 = vcmp.ge.s32.totalorder %v1728_v10, 0  ;;  %vm277_vm1 = vcmp.lt.s32.totalorder %v1728_v10, 8  ;;  %v307_v14 = vmul.u32 8, %v1728_v10 }
  0x1d   : > { %2714 = vst [vmem:[#allocation3_spill] sm:$0xff] %v1728_v10  ;;  %vm1742_vm2 = vmand %vm275_vm0, %vm277_vm1  ;;  %v309_v16 = vrot.slane %v1728_v10, 5  ;;  %v1748_v17 = vadd.s32 1, %v1728_v10  ;;  %v443_v18 = vrot.slane %v1726_v9, 5  ;;  %v1752_v19 = vsub.f32 1.0, %v1732_v12 }
  0x1e   : > { %2715 = vst [vmem:[#allocation4_spill] sm:$0xff] %v1732_v12  ;;  %v283_v21 = vrot.slane %v1735_v13, 5  ;;  %v291_v23 = vsel %vm1742_vm2, 1, %v1656_v22  ;;  %vm276_vm11 = vcmp.ge.s32.totalorder %v1761_v24, 0  ;;  %vm278_vm12 = vcmp.lt.s32.totalorder %v1761_v24, 8 }
  0x1f   : > { %2716 = vst [vmem:[#allocation5_spill] sm:$0xff] %v1735_v13  ;;  %v1521_v25 = vrot.slane %v291_v23, 9  ;;  %v310_v26 = vrot.slane %v309_v16, 4  ;;  %vm435_vm3 = vcmp.ge.s32.totalorder %v1748_v17, 0  ;;  %vm437_vm4 = vcmp.lt.s32.totalorder %v1748_v17, 8 }
  0x20   : > { %2719 = vst [vmem:[#allocation6_spill] sm:$0xff] %v1748_v17  ;;  %v284_v27 = vrot.slane %v283_v21, 4  ;;  %vm1767_vm5 = vmand %vm435_vm3, %vm437_vm4  ;;  %v444_v29 = vrot.slane %v443_v18, 4  ;;  %v467_v30 = vrot.slane %v1748_v17, 5  ;;  %v601_v31 = vmul.u32 8, %v1748_v17 }
  0x21   : > { %2720 = vst [vmem:[#allocation7_spill] sm:$0xff] %v1752_v19  ;;  %vm1773_vm6 = vcmp.ne.s32.totalorder %v1521_v25, 0  ;;  %v313_v33 = vadd.s32 %v310_v26, %v307_v14  ;;  %v451_v34 = vsel %vm1767_vm5, 1, %v1656_v22  ;;  %v285_v35 = vrot.slane %v1752_v19, 5 }
  0x22   : > { %2721 = vst [vmem:[#allocation8_spill] sm:$0xff] %v1761_v24  ;;  %v289_v36 = vmul.f32 %v284_v27, %v1735_v13  ;;  %vm299_vm7 = vmand %vm1742_vm2, %vm1773_vm6  ;;  %v449_v37 = vmul.f32 %v444_v29, %v1735_v13  ;;  %v1525_v38 = vrot.slane %v451_v34, 9  ;;  %v468_v39 = vrot.slane %v467_v30, 4 }
  0x23   : > { %v1523_v41 = vsel %vm299_vm7, 1.0, %v2685_v40  ;;  %v315_v42 = vperm.slane %v313_v33, 0  ;;  %v591_v43 = vmul.f32 %v284_v27, %v1726_v9  ;;  %vm593_vm8 = vmand %vm1767_vm5, %vm1773_vm6  ;;  %v603_v44 = vadd.s32 %v601_v31, %v310_v26 }
  0x24   : > { %v305_v45 = vmul.f32 %v1523_v41, %v289_v36  ;;  %vm1793_vm9 = vcmp.ne.s32.totalorder %v1525_v38, 0  ;;  %v471_v47 = vadd.s32 %v468_v39, %v307_v14  ;;  %v1529_v48 = vsel %vm593_vm8, 1.0, %v2685_v40  ;;  %vm1858_vm6 = vmand %vm276_vm11, %vm278_vm12 }
  0x25   : > { %v1798_v49 = vperm.slane %v315_v42, 0  ;;  %vm459_vm10 = vmand %vm1742_vm2, %vm1793_vm9  ;;  %v599_v50 = vmul.f32 %v1529_v48, %v591_v43  ;;  %v605_v51 = vperm.slane %v603_v44, 0  ;;  %v723_v52 = vmul.f32 %v444_v29, %v1726_v9 }
  0x26   : > { %v357_v53 = vperm.slane %v305_v45, 0  ;;  %v1527_v54 = vsel %vm459_vm10, 1.0, %v2685_v40  ;;  %v473_v55 = vperm.slane %v471_v47, 0  ;;  %vm725_vm13 = vmand %vm1767_vm5, %vm1793_vm9  ;;  %v733_v56 = vadd.s32 %v601_v31, %v468_v39 }
  0x27   : > { %vm351_vm14 = vcmp.eq.s32.totalorder %v1755_v20, %v1798_v49  ;;  %v465_v57 = vmul.f32 %v1527_v54, %v449_v37  ;;  %v1814_v58 = vperm.slane %v605_v51, 0  ;;  %v647_v59 = vperm.slane %v599_v50, 0 }
  0x28   : > { %v1816_v60 = vperm.slane %v357_v53, 0  ;;  %v1818_v61 = vperm.slane %v473_v55, 0  ;;  %v1531_v62 = vsel %vm725_vm13, 1.0, %v2685_v40  ;;  %v735_v63 = vperm.slane %v733_v56, 0 }
  0x29   : > { %v515_v0 = vperm.slane %v465_v57, 0  ;;  %vm641_vm15 = vcmp.eq.s32.totalorder %v1755_v20, %v1814_v58  ;;  %v1823_v1 = vperm.slane %v647_v59, 0  ;;  %v731_v2 = vmul.f32 %v1531_v62, %v723_v52 }
  0x2a   : > { %v397_v3 = vsel %vm351_vm14, %v1816_v60, 0.0  ;;  %vm509_vm1 = vcmp.eq.s32.totalorder %v1755_v20, %v1818_v61  ;;  %v1828_v4 = vperm.slane %v735_v63, 0  ;;  %v316_v5 = vperm.slane %v313_v33, 4 }
  0x2b   : > { %v1830_v6 = vperm.slane %v515_v0, 0  ;;  %v687_v7 = vsel %vm641_vm15, %v1823_v1, 0.0  ;;  %v777_v8 = vperm.slane %v731_v2, 0  ;;  %v358_v14 = vperm.slane %v305_v45, 4 }
  0x2c   : > { %vm771_vm2 = vcmp.eq.s32.totalorder %v1755_v20, %v1828_v4  ;;  %v1835_v15 = vperm.slane %v316_v5, 0  ;;  %v474_v16 = vperm.slane %v471_v47, 4  ;;  %v516_v18 = vperm.slane %v465_v57, 4 }
  0x2d   : > { %v555_v21 = vsel %vm509_vm1, %v1830_v6, 0.0  ;;  %v1838_v23 = vperm.slane %v777_v8, 0  ;;  %v1840_v25 = vperm.slane %v358_v14, 0  ;;  %v606_v26 = vperm.slane %v603_v44, 4 }
  0x2e   : > { %v587_v27 = vadd.f32 %v555_v21, %v397_v3  ;;  %vm352_vm4 = vcmp.eq.s32.totalorder %v1755_v20, %v1835_v15  ;;  %v1844_v28 = vperm.slane %v474_v16, 0  ;;  %v1846_v29 = vperm.slane %v516_v18, 0 }
  0x2f   : > { %v817_v30 = vsel %vm771_vm2, %v1838_v23, 0.0  ;;  %v398_v31 = vsel %vm352_vm4, %v1840_v25, 0.0  ;;  %v1850_v32 = vperm.slane %v606_v26, 0  ;;  %v648_v33 = vperm.slane %v599_v50, 4 }
  0x30   : > { %v719_v34 = vadd.f32 %v687_v7, %v587_v27  ;;  %vm510_vm5 = vcmp.eq.s32.totalorder %v1755_v20, %v1844_v28  ;;  %v736_v36 = vperm.slane %v733_v56, 4  ;;  %v778_v37 = vperm.slane %v731_v2, 4 }
  0x31   : > { %v556_v39 = vsel %vm510_vm5, %v1846_v29, 0.0  ;;  %vm642_vm7 = vcmp.eq.s32.totalorder %v1755_v20, %v1850_v32  ;;  %v1865_v41 = vperm.slane %v648_v33, 0  ;;  %v286_v42 = vrot.slane %v285_v35, 4 }
  0x32   : > { %v1869_v43 = vadd.f32 %v817_v30, %v719_v34  ;;  %v588_v44 = vadd.f32 %v556_v39, %v398_v31  ;;  %v1871_v45 = vperm.slane %v736_v36, 0  ;;  %v1873_v46 = vperm.slane %v778_v37, 0 }
  0x33   : > { %v688_v47 = vsel %vm642_vm7, %v1865_v41, 0.0  ;;  %v292_v48 = vsel %vm1858_vm6, 1, %v1656_v22  ;;  %v308_v50 = vmul.u32 8, %v1761_v24  ;;  %v311_v52 = vrot.slane %v1761_v24, 5 }
  0x34   : > { %974 = vmatpush.msra.mxu0 %v1869_v43  ;;  %v720_v51 = vadd.f32 %v688_v47, %v588_v44  ;;  %vm772_vm8 = vcmp.eq.s32.totalorder %v1755_v20, %v1871_v45  ;;  %v1522_v35 = vrot.slane %v292_v48, 9  ;;  %v290_v54 = vmul.f32 %v286_v42, %v1752_v19 }
  0x35   : > { %v818_v53 = vsel %vm772_vm8, %v1873_v46, 0.0  ;;  %v1887_v55 = vadd.s32 1, %v1761_v24  ;;  %v445_v56 = vrot.slane %v1732_v12, 5  ;;  %v312_v62 = vrot.slane %v311_v52, 4 }
  0x36   : > { %v1890_v57 = vadd.f32 %v818_v53, %v720_v51  ;;  %vm1892_vm9 = vcmp.ne.s32.totalorder %v1522_v35, 0  ;;  %v592_v63 = vmul.f32 %v286_v42, %v1732_v12  ;;  %v1914_v14 = vadd.s32 48, %v1730_v11 }
  0x37   : > { %2730 = vst [vmem:[#allocation9_spill] sm:$0xff] %v1887_v55  ;;  %vm300_vm10 = vmand %vm1858_vm6, %vm1892_vm9  ;;  %vm436_vm12 = vcmp.ge.s32.totalorder %v1887_v55, 0  ;;  %vm438_vm13 = vcmp.lt.s32.totalorder %v1887_v55, 8  ;;  %v446_v0 = vrot.slane %v445_v56, 4  ;;  %v469_v2 = vrot.slane %v1887_v55, 5 }
  0x38   : > { %997 = vmatpush.msra.mxu1 %v1890_v57  ;;  %v1524_v3 = vsel %vm300_vm10, 1.0, %v2685_v40  ;;  %v314_v5 = vadd.s32 %v312_v62, %v308_v50  ;;  %vm1908_vm14 = vmand %vm436_vm12, %vm438_vm13  ;;  %v602_v8 = vmul.u32 8, %v1887_v55  ;;  %vm347_vm7 = vcmp.eq.s32.totalorder %v1914_v14, %v1798_v49 }
  0x39   : > { %v306_v16 = vmul.f32 %v1524_v3, %v290_v54  ;;  %v450_v18 = vmul.f32 %v446_v0, %v1752_v19  ;;  %v452_v21 = vsel %vm1908_vm14, 1, %v1656_v22  ;;  %v470_v26 = vrot.slane %v469_v2, 4  ;;  %vm594_vm15 = vmand %vm1908_vm14, %vm1892_vm9 }
  0x3a   : > { %v317_v27 = vperm.slane %v314_v5, 0  ;;  %v1526_v30 = vrot.slane %v452_v21, 9  ;;  %v1530_v31 = vsel %vm594_vm15, 1.0, %v2685_v40  ;;  %v604_v33 = vadd.s32 %v602_v8, %v312_v62 }
  0x3b   : > { %v359_v34 = vperm.slane %v306_v16, 0  ;;  %v472_v36 = vadd.s32 %v470_v26, %v308_v50  ;;  %v600_v37 = vmul.f32 %v1530_v31, %v592_v63  ;;  %v724_v39 = vmul.f32 %v446_v0, %v1732_v12 }
  0x3c   : > { %v1926_v42 = vperm.slane %v317_v27, 0  ;;  %vm1928_vm1 = vcmp.ne.s32.totalorder %v1526_v30, 0  ;;  %v607_v44 = vperm.slane %v604_v33, 0  ;;  %v734_v47 = vadd.s32 %v602_v8, %v470_v26 }
  0x3d   : > { %v1932_v48 = vperm.slane %v359_v34, 0  ;;  %vm460_vm2 = vmand %vm1858_vm6, %vm1928_vm1  ;;  %v475_v51 = vperm.slane %v472_v36, 0  ;;  %v649_v50 = vperm.slane %v600_v37, 0  ;;  %v318_v35 = vperm.slane %v314_v5, 4 }
  0x3e   : > { %vm353_vm4 = vcmp.eq.s32.totalorder %v1755_v20, %v1926_v42  ;;  %v1528_v52 = vsel %vm460_vm2, 1.0, %v2685_v40  ;;  %v1941_v53 = vperm.slane %v607_v44, 0  ;;  %vm726_vm5 = vmand %vm1908_vm14, %vm1928_vm1  ;;  %v737_v54 = vperm.slane %v734_v47, 0 }
  0x3f   : > { %v399_v38 = vsel %vm353_vm4, %v1932_v48, 0.0  ;;  %v466_v56 = vmul.f32 %v1528_v52, %v450_v18  ;;  %v1950_v59 = vperm.slane %v475_v51, 0  ;;  %v1952_v62 = vperm.slane %v649_v50, 0 }
  0x40   : > { %vm643_vm6 = vcmp.eq.s32.totalorder %v1755_v20, %v1941_v53  ;;  %v1532_v63 = vsel %vm726_vm5, 1.0, %v2685_v40  ;;  %v1957_v0 = vperm.slane %v737_v54, 0  ;;  %v1959_v2 = vperm.slane %v318_v35, 0 }
  0x41   : > { %vm511_vm8 = vcmp.eq.s32.totalorder %v1755_v20, %v1950_v59  ;;  %v517_v3 = vperm.slane %v466_v56, 0  ;;  %v689_v5 = vsel %vm643_vm6, %v1952_v62, 0.0  ;;  %v732_v7 = vmul.f32 %v1532_v63, %v724_v39 }
  0x42   : > { %vm773_vm9 = vcmp.eq.s32.totalorder %v1755_v20, %v1957_v0  ;;  %vm354_vm10 = vcmp.eq.s32.totalorder %v1755_v20, %v1959_v2  ;;  %v360_v8 = vperm.slane %v306_v16, 4  ;;  %v476_v18 = vperm.slane %v472_v36, 4 }
  0x43   : > { %v1968_v21 = vperm.slane %v517_v3, 0  ;;  %v779_v26 = vperm.slane %v732_v7, 0  ;;  %v518_v27 = vperm.slane %v466_v56, 4  ;;  %v608_v30 = vperm.slane %v604_v33, 4 }
  0x44   : > { %v1970_v31 = vperm.slane %v360_v8, 0  ;;  %v1972_v34 = vperm.slane %v476_v18, 0  ;;  %v650_v22 = vperm.slane %v600_v37, 4  ;;  %v738_v44 = vperm.slane %v734_v47, 4 }
  0x45   : > { %v557_v39 = vsel %vm511_vm8, %v1968_v21, 0.0  ;;  %v1978_v51 = vperm.slane %v779_v26, 0  ;;  %v1980_v16 = vperm.slane %v518_v27, 0  ;;  %v1982_v36 = vperm.slane %v608_v30, 0 }
  0x46   : > { %v589_v50 = vadd.f32 %v557_v39, %v399_v38  ;;  %v400_v33 = vsel %vm354_vm10, %v1970_v31, 0.0  ;;  %vm512_vm13 = vcmp.eq.s32.totalorder %v1755_v20, %v1972_v34  ;;  %v1990_v37 = vperm.slane %v650_v22, 0 }
  0x47   : > { %v819_v47 = vsel %vm773_vm9, %v1978_v51, 0.0  ;;  %v558_v35 = vsel %vm512_vm13, %v1980_v16, 0.0  ;;  %vm644_vm14 = vcmp.eq.s32.totalorder %v1755_v20, %v1982_v36  ;;  %v1999_v52 = vperm.slane %v738_v44, 0 }
  0x48   : > { %v721_v54 = vadd.f32 %v689_v5, %v589_v50  ;;  %v590_v38 = vadd.f32 %v558_v35, %v400_v33  ;;  %v690_v56 = vsel %vm644_vm14, %v1990_v37, 0.0  ;;  %v780_v63 = vperm.slane %v732_v7, 4 }
  0x49   : > { %vm774_vm15 = vcmp.eq.s32.totalorder %v1755_v20, %v1999_v52  ;;  %v393_v3 = vsel %vm347_vm7, %v1816_v60, 0.0  ;;  %vm505_vm1 = vcmp.eq.s32.totalorder %v1914_v14, %v1818_v61  ;;  %vm637_vm2 = vcmp.eq.s32.totalorder %v1914_v14, %v1814_v58 }
  0x4a   : > { %v2012_v8 = vadd.f32 %v819_v47, %v721_v54  ;;  %v722_v5 = vadd.f32 %v690_v56, %v590_v38  ;;  %v2014_v18 = vperm.slane %v780_v63, 0  ;;  %v551_v7 = vsel %vm505_vm1, %v1830_v6, 0.0 }
  0x4b   : > { %v583_v26 = vadd.f32 %v551_v7, %v393_v3  ;;  %v683_v20 = vsel %vm637_vm2, %v1823_v1, 0.0  ;;  %vm767_vm4 = vcmp.eq.s32.totalorder %v1914_v14, %v1828_v4  ;;  %vm348_vm5 = vcmp.eq.s32.totalorder %v1914_v14, %v1835_v15 }
  0x4c   : > { %1020 = vmatpush.msra.mxu2 %v2012_v8  ;;  %v820_v27 = vsel %vm774_vm15, %v2014_v18, 0.0  ;;  %v813_v30 = vsel %vm767_vm4, %v1838_v23, 0.0  ;;  %v394_v22 = vsel %vm348_vm5, %v1840_v25, 0.0  ;;  %vm506_vm7 = vcmp.eq.s32.totalorder %v1914_v14, %v1844_v28 }
  0x4d   : > { %v2028_v44 = vadd.f32 %v820_v27, %v722_v5  ;;  %v715_v39 = vadd.f32 %v683_v20, %v583_v26  ;;  %v552_v50 = vsel %vm506_vm7, %v1846_v29, 0.0  ;;  %vm638_vm6 = vcmp.eq.s32.totalorder %v1914_v14, %v1850_v32 }
  0x4e   : > { %v584_v33 = vadd.f32 %v552_v50, %v394_v22  ;;  %v684_v47 = vsel %vm638_vm6, %v1865_v41, 0.0  ;;  %vm768_vm8 = vcmp.eq.s32.totalorder %v1914_v14, %v1871_v45  ;;  %vm349_vm9 = vcmp.eq.s32.totalorder %v1914_v14, %v1926_v42 }
  0x4f   : > { %1043 = vmatpush.msra.mxu3 %v2028_v44  ;;  %v2039_v35 = vadd.f32 %v813_v30, %v715_v39  ;;  %v814_v54 = vsel %vm768_vm8, %v1873_v46, 0.0  ;;  %v395_v38 = vsel %vm349_vm9, %v1932_v48, 0.0  ;;  %vm507_vm10 = vcmp.eq.s32.totalorder %v1914_v14, %v1950_v59 }
  0x50   : > { %v716_v56 = vadd.f32 %v684_v47, %v584_v33  ;;  %v553_v63 = vsel %vm507_vm10, %v1968_v21, 0.0  ;;  %vm639_vm13 = vcmp.eq.s32.totalorder %v1914_v14, %v1941_v53  ;;  %vm769_vm14 = vcmp.eq.s32.totalorder %v1914_v14, %v1957_v0 }
  0x51   : > { %975 = vmatpush.msra.mxu0 %v2039_v35  ;;  %v585_v3 = vadd.f32 %v553_v63, %v395_v38  ;;  %v685_v5 = vsel %vm639_vm13, %v1952_v62, 0.0  ;;  %v815_v7 = vsel %vm769_vm14, %v1978_v51, 0.0  ;;  %vm350_vm15 = vcmp.eq.s32.totalorder %v1914_v14, %v1959_v2 }
  0x52   : > { %v2055_v26 = vadd.f32 %v814_v54, %v716_v56  ;;  %v396_v20 = vsel %vm350_vm15, %v1970_v31, 0.0  ;;  %vm508_vm1 = vcmp.eq.s32.totalorder %v1914_v14, %v1972_v34  ;;  %vm640_vm2 = vcmp.eq.s32.totalorder %v1914_v14, %v1982_v36 }
  0x53   : > { %v717_v27 = vadd.f32 %v685_v5, %v585_v3  ;;  %v554_v30 = vsel %vm508_vm1, %v1980_v16, 0.0  ;;  %v686_v22 = vsel %vm640_vm2, %v1990_v37, 0.0  ;;  %vm770_vm4 = vcmp.eq.s32.totalorder %v1914_v14, %v1999_v52 }
  0x54   : > { %998 = vmatpush.msra.mxu1 %v2055_v26  ;;  %v586_v39 = vadd.f32 %v554_v30, %v396_v20  ;;  %v816_v50 = vsel %vm770_vm4, %v2014_v18, 0.0  ;;  %v270_v33 = vadd.s32 40, %v1730_v11  ;;  %v2072_v54 = vadd.s32 32, %v1730_v11 }
  0x55   : > { %v2069_v47 = vadd.f32 %v815_v7, %v717_v27  ;;  %v2075_v38 = vadd.s32 24, %v1730_v11  ;;  %v2078_v56 = vadd.s32 16, %v1730_v11 }
  0x56   : > { %v718_v63 = vadd.f32 %v686_v22, %v586_v39  ;;  %vm343_vm5 = vcmp.eq.s32.totalorder %v270_v33, %v1798_v49  ;;  %vm501_vm7 = vcmp.eq.s32.totalorder %v270_v33, %v1818_v61  ;;  %vm633_vm6 = vcmp.eq.s32.totalorder %v270_v33, %v1814_v58 }
  0x57   : > { %1021 = vmatpush.msra.mxu2 %v2069_v47  ;;  %v389_v14 = vsel %vm343_vm5, %v1816_v60, 0.0  ;;  %v547_v3 = vsel %vm501_vm7, %v1830_v6, 0.0  ;;  %v679_v5 = vsel %vm633_vm6, %v1823_v1, 0.0  ;;  %vm763_vm8 = vcmp.eq.s32.totalorder %v270_v33, %v1828_v4 }
  0x58   : > { %v2088_v7 = vadd.f32 %v816_v50, %v718_v63  ;;  %v579_v20 = vadd.f32 %v547_v3, %v389_v14  ;;  %v809_v27 = vsel %vm763_vm8, %v1838_v23, 0.0  ;;  %vm344_vm9 = vcmp.eq.s32.totalorder %v270_v33, %v1835_v15 }
  0x59   : > { %v390_v30 = vsel %vm344_vm9, %v1840_v25, 0.0  ;;  %vm502_vm10 = vcmp.eq.s32.totalorder %v270_v33, %v1844_v28  ;;  %vm634_vm13 = vcmp.eq.s32.totalorder %v270_v33, %v1850_v32  ;;  %vm764_vm14 = vcmp.eq.s32.totalorder %v270_v33, %v1871_v45 }
  0x5a   : > { %1044 = vmatpush.msra.mxu3 %v2088_v7  ;;  %v711_v22 = vadd.f32 %v679_v5, %v579_v20  ;;  %v548_v39 = vsel %vm502_vm10, %v1846_v29, 0.0  ;;  %v680_v50 = vsel %vm634_vm13, %v1865_v41, 0.0  ;;  %v810_v63 = vsel %vm764_vm14, %v1873_v46, 0.0 }
  0x5b   : > { %v580_v14 = vadd.f32 %v548_v39, %v390_v30  ;;  %vm345_vm15 = vcmp.eq.s32.totalorder %v270_v33, %v1926_v42  ;;  %vm503_vm1 = vcmp.eq.s32.totalorder %v270_v33, %v1950_v59  ;;  %vm635_vm2 = vcmp.eq.s32.totalorder %v270_v33, %v1941_v53 }
  0x5c   : > { %v2103_v3 = vadd.f32 %v809_v27, %v711_v22  ;;  %v391_v40 = vsel %vm345_vm15, %v1932_v48, 0.0  ;;  %v549_v12 = vsel %vm503_vm1, %v1968_v21, 0.0  ;;  %v681_v5 = vsel %vm635_vm2, %v1952_v62, 0.0 }
  0x5d   : > { %v712_v20 = vadd.f32 %v680_v50, %v580_v14  ;;  %v581_v19 = vadd.f32 %v549_v12, %v391_v40  ;;  %vm765_vm4 = vcmp.eq.s32.totalorder %v270_v33, %v1957_v0  ;;  %vm346_vm5 = vcmp.eq.s32.totalorder %v270_v33, %v1959_v2 }
  0x5e   : > { %976 = vmatpush.msra.mxu0 %v2103_v3  ;;  %v811_v30 = vsel %vm765_vm4, %v1978_v51, 0.0  ;;  %v392_v39 = vsel %vm346_vm5, %v1970_v31, 0.0  ;;  %vm504_vm7 = vcmp.eq.s32.totalorder %v270_v33, %v1972_v34  ;;  %vm636_vm6 = vcmp.eq.s32.totalorder %v270_v33, %v1982_v36 }
  0x5f   : > { %v2115_v27 = vadd.f32 %v810_v63, %v712_v20  ;;  %v713_v22 = vadd.f32 %v681_v5, %v581_v19  ;;  %v550_v50 = vsel %vm504_vm7, %v1980_v16, 0.0  ;;  %v682_v12 = vsel %vm636_vm6, %v1990_v37, 0.0 }
  0x60   : > { %v582_v40 = vadd.f32 %v550_v50, %v392_v39  ;;  %vm766_vm8 = vcmp.eq.s32.totalorder %v270_v33, %v1999_v52  ;;  %vm339_vm9 = vcmp.eq.s32.totalorder %v2072_v54, %v1798_v49  ;;  %vm497_vm10 = vcmp.eq.s32.totalorder %v2072_v54, %v1818_v61 }
  0x61   : > { %999 = vmatpush.msra.mxu1 %v2115_v27  ;;  %v2125_v14 = vadd.f32 %v811_v30, %v713_v22  ;;  %v812_v63 = vsel %vm766_vm8, %v2014_v18, 0.0  ;;  %v385_v19 = vsel %vm339_vm9, %v1816_v60, 0.0  ;;  %v543_v5 = vsel %vm497_vm10, %v1830_v6, 0.0 }
  0x62   : > { %v714_v20 = vadd.f32 %v682_v12, %v582_v40  ;;  %v575_v39 = vadd.f32 %v543_v5, %v385_v19  ;;  %vm629_vm13 = vcmp.eq.s32.totalorder %v2072_v54, %v1814_v58  ;;  %vm759_vm14 = vcmp.eq.s32.totalorder %v2072_v54, %v1828_v4 }
  0x63   : > { %1022 = vmatpush.msra.mxu2 %v2125_v14  ;;  %v675_v33 = vsel %vm629_vm13, %v1823_v1, 0.0  ;;  %v805_v30 = vsel %vm759_vm14, %v1838_v23, 0.0  ;;  %vm340_vm15 = vcmp.eq.s32.totalorder %v2072_v54, %v1835_v15  ;;  %vm498_vm1 = vcmp.eq.s32.totalorder %v2072_v54, %v1844_v28 }
  0x64   : > { %v2141_v22 = vadd.f32 %v812_v63, %v714_v20  ;;  %v707_v50 = vadd.f32 %v675_v33, %v575_v39  ;;  %v386_v12 = vsel %vm340_vm15, %v1840_v25, 0.0  ;;  %v544_v40 = vsel %vm498_vm1, %v1846_v29, 0.0 }
  0x65   : > { %v576_v19 = vadd.f32 %v544_v40, %v386_v12  ;;  %vm630_vm2 = vcmp.eq.s32.totalorder %v2072_v54, %v1850_v32  ;;  %vm760_vm4 = vcmp.eq.s32.totalorder %v2072_v54, %v1871_v45  ;;  %vm341_vm5 = vcmp.eq.s32.totalorder %v2072_v54, %v1926_v42 }
  0x66   : > { %1045 = vmatpush.msra.mxu3 %v2141_v22  ;;  %v2152_v5 = vadd.f32 %v805_v30, %v707_v50  ;;  %v676_v63 = vsel %vm630_vm2, %v1865_v41, 0.0  ;;  %v806_v20 = vsel %vm760_vm4, %v1873_v46, 0.0  ;;  %v387_v39 = vsel %vm341_vm5, %v1932_v48, 0.0 }
  0x67   : > { %v708_v33 = vadd.f32 %v676_v63, %v576_v19  ;;  %vm499_vm7 = vcmp.eq.s32.totalorder %v2072_v54, %v1950_v59  ;;  %vm631_vm6 = vcmp.eq.s32.totalorder %v2072_v54, %v1941_v53  ;;  %vm761_vm8 = vcmp.eq.s32.totalorder %v2072_v54, %v1957_v0 }
  0x68   : > { %977 = vmatpush.msra.mxu0 %v2152_v5  ;;  %v545_v30 = vsel %vm499_vm7, %v1968_v21, 0.0  ;;  %v677_v50 = vsel %vm631_vm6, %v1952_v62, 0.0  ;;  %v807_v12 = vsel %vm761_vm8, %v1978_v51, 0.0  ;;  %vm342_vm9 = vcmp.eq.s32.totalorder %v2072_v54, %v1959_v2 }
  0x69   : > { %v2169_v40 = vadd.f32 %v806_v20, %v708_v33  ;;  %v577_v19 = vadd.f32 %v545_v30, %v387_v39  ;;  %v388_v63 = vsel %vm342_vm9, %v1970_v31, 0.0  ;;  %vm500_vm10 = vcmp.eq.s32.totalorder %v2072_v54, %v1972_v34 }
  0x6a   : > { %v546_v9 = vsel %vm500_vm10, %v1980_v16, 0.0  ;;  %vm632_vm13 = vcmp.eq.s32.totalorder %v2072_v54, %v1982_v36  ;;  %vm762_vm14 = vcmp.eq.s32.totalorder %v2072_v54, %v1999_v52  ;;  %vm335_vm15 = vcmp.eq.s32.totalorder %v2075_v38, %v1798_v49 }
  0x6b   : > { %1000 = vmatpush.msra.mxu1 %v2169_v40  ;;  %v709_v20 = vadd.f32 %v677_v50, %v577_v19  ;;  %v578_v39 = vadd.f32 %v546_v9, %v388_v63  ;;  %v678_v33 = vsel %vm632_vm13, %v1990_v37, 0.0  ;;  %v808_v30 = vsel %vm762_vm14, %v2014_v18, 0.0 }
  0x6c   : > { %v381_v13 = vsel %vm335_vm15, %v1816_v60, 0.0  ;;  %vm493_vm1 = vcmp.eq.s32.totalorder %v2075_v38, %v1818_v61  ;;  %vm625_vm2 = vcmp.eq.s32.totalorder %v2075_v38, %v1814_v58  ;;  %vm755_vm4 = vcmp.eq.s32.totalorder %v2075_v38, %v1828_v4 }
  0x6d   : > { %v2191_v54 = vadd.f32 %v807_v12, %v709_v20  ;;  %v710_v55 = vadd.f32 %v678_v33, %v578_v39  ;;  %v539_v9 = vsel %vm493_vm1, %v1830_v6, 0.0  ;;  %v671_v50 = vsel %vm625_vm2, %v1823_v1, 0.0 }
  0x6e   : > { %v571_v19 = vadd.f32 %v539_v9, %v381_v13  ;;  %v801_v63 = vsel %vm755_vm4, %v1838_v23, 0.0  ;;  %vm336_vm5 = vcmp.eq.s32.totalorder %v2075_v38, %v1835_v15  ;;  %vm494_vm7 = vcmp.eq.s32.totalorder %v2075_v38, %v1844_v28 }
  0x6f   : > { %1023 = vmatpush.msra.mxu2 %v2191_v54  ;;  %v2201_v24 = vadd.f32 %v808_v30, %v710_v55  ;;  %v382_v12 = vsel %vm336_vm5, %v1840_v25, 0.0  ;;  %v540_v20 = vsel %vm494_vm7, %v1846_v29, 0.0  ;;  %vm626_vm6 = vcmp.eq.s32.totalorder %v2075_v38, %v1850_v32 }
  0x70   : > { %v703_v13 = vadd.f32 %v671_v50, %v571_v19  ;;  %v572_v39 = vadd.f32 %v540_v20, %v382_v12  ;;  %v672_v33 = vsel %vm626_vm6, %v1865_v41, 0.0  ;;  %vm756_vm8 = vcmp.eq.s32.totalorder %v2075_v38, %v1871_v45 }
  0x71   : > { %2737 = vst [vmem:[#allocation10_spill] sm:$0xff] %v2201_v24  ;;  %1046 = vmatpush.msra.mxu3 %v2201_v24  ;;  %v802_v9 = vsel %vm756_vm8, %v1873_v46, 0.0  ;;  %vm337_vm9 = vcmp.eq.s32.totalorder %v2075_v38, %v1926_v42  ;;  %vm495_vm10 = vcmp.eq.s32.totalorder %v2075_v38, %v1950_v59  ;;  %vm627_vm13 = vcmp.eq.s32.totalorder %v2075_v38, %v1941_v53 }
  0x72   : > { %v2218_v55 = vadd.f32 %v801_v63, %v703_v13  ;;  %v704_v30 = vadd.f32 %v672_v33, %v572_v39  ;;  %v383_v50 = vsel %vm337_vm9, %v1932_v48, 0.0  ;;  %v541_v19 = vsel %vm495_vm10, %v1968_v21, 0.0 }
  0x73   : > { %v573_v12 = vadd.f32 %v541_v19, %v383_v50  ;;  %v673_v20 = vsel %vm627_vm13, %v1952_v62, 0.0  ;;  %vm757_vm14 = vcmp.eq.s32.totalorder %v2075_v38, %v1957_v0  ;;  %vm338_vm15 = vcmp.eq.s32.totalorder %v2075_v38, %v1959_v2 }
  0x74   : > { %978 = vmatpush.msra.mxu0 %v2218_v55  ;;  %v2228_v17 = vadd.f32 %v802_v9, %v704_v30  ;;  %v803_v63 = vsel %vm757_vm14, %v1978_v51, 0.0  ;;  %v384_v13 = vsel %vm338_vm15, %v1970_v31, 0.0  ;;  %vm496_vm1 = vcmp.eq.s32.totalorder %v2075_v38, %v1972_v34 }
  0x75   : > { %v705_v39 = vadd.f32 %v673_v20, %v573_v12  ;;  %v542_v33 = vsel %vm496_vm1, %v1980_v16, 0.0  ;;  %vm628_vm2 = vcmp.eq.s32.totalorder %v2075_v38, %v1982_v36  ;;  %vm758_vm4 = vcmp.eq.s32.totalorder %v2075_v38, %v1999_v52 }
  0x76   : > { %1001 = vmatpush.msra.mxu1 %v2228_v17  ;;  %v574_v9 = vadd.f32 %v542_v33, %v384_v13  ;;  %v674_v30 = vsel %vm628_vm2, %v1990_v37, 0.0  ;;  %v804_v50 = vsel %vm758_vm4, %v2014_v18, 0.0  ;;  %vm331_vm5 = vcmp.eq.s32.totalorder %v2078_v56, %v1798_v49 }
  0x77   : > { %v2244_v19 = vadd.f32 %v803_v63, %v705_v39  ;;  %v377_v12 = vsel %vm331_vm5, %v1816_v60, 0.0  ;;  %vm489_vm7 = vcmp.eq.s32.totalorder %v2078_v56, %v1818_v61  ;;  %vm621_vm6 = vcmp.eq.s32.totalorder %v2078_v56, %v1814_v58 }
  0x78   : > { %v706_v38 = vadd.f32 %v674_v30, %v574_v9  ;;  %v535_v20 = vsel %vm489_vm7, %v1830_v6, 0.0  ;;  %v667_v13 = vsel %vm621_vm6, %v1823_v1, 0.0  ;;  %vm751_vm8 = vcmp.eq.s32.totalorder %v2078_v56, %v1828_v4 }
  0x79   : > { %2738 = vst [vmem:[#allocation11_spill] sm:$0xff] %v2244_v19  ;;  %1024 = vmatpush.msra.mxu2 %v2244_v19  ;;  %v567_v63 = vadd.f32 %v535_v20, %v377_v12  ;;  %v797_v39 = vsel %vm751_vm8, %v1838_v23, 0.0  ;;  %vm332_vm9 = vcmp.eq.s32.totalorder %v2078_v56, %v1835_v15  ;;  %vm490_vm10 = vcmp.eq.s32.totalorder %v2078_v56, %v1844_v28 }
  0x7a   : > { %v2261_v33 = vadd.f32 %v804_v50, %v706_v38  ;;  %v378_v9 = vsel %vm332_vm9, %v1840_v25, 0.0  ;;  %v536_v30 = vsel %vm490_vm10, %v1846_v29, 0.0  ;;  %vm622_vm13 = vcmp.eq.s32.totalorder %v2078_v56, %v1850_v32 }
  0x7b   : > { %v699_v10 = vadd.f32 %v667_v13, %v567_v63  ;;  %v568_v24 = vadd.f32 %v536_v30, %v378_v9  ;;  %v668_v12 = vsel %vm622_vm13, %v1865_v41, 0.0  ;;  %vm752_vm14 = vcmp.eq.s32.totalorder %v2078_v56, %v1871_v45 }
  0x7c   : > { %2739 = vst [vmem:[#allocation12_spill] sm:$0xff] %v2261_v33  ;;  %1047 = vmatpush.msra.mxu3 %v2261_v33  ;;  %v798_v20 = vsel %vm752_vm14, %v1873_v46, 0.0  ;;  %vm333_vm15 = vcmp.eq.s32.totalorder %v2078_v56, %v1926_v42  ;;  %vm491_vm1 = vcmp.eq.s32.totalorder %v2078_v56, %v1950_v59  ;;  %vm623_vm2 = vcmp.eq.s32.totalorder %v2078_v56, %v1941_v53 }
  0x7d   : > { %v2278_v50 = vadd.f32 %v797_v39, %v699_v10  ;;  %v700_v38 = vadd.f32 %v668_v12, %v568_v24  ;;  %v379_v13 = vsel %vm333_vm15, %v1932_v48, 0.0  ;;  %v537_v63 = vsel %vm491_vm1, %v1968_v21, 0.0 }
  0x7e   : > { %v569_v9 = vadd.f32 %v537_v63, %v379_v13  ;;  %v669_v30 = vsel %vm623_vm2, %v1952_v62, 0.0  ;;  %vm753_vm4 = vcmp.eq.s32.totalorder %v2078_v56, %v1957_v0  ;;  %vm334_vm5 = vcmp.eq.s32.totalorder %v2078_v56, %v1959_v2 }
  0x7f   : > { %2740 = vst [vmem:[#allocation13_spill] sm:$0xff] %v2278_v50  ;;  %979 = vmatpush.msra.mxu0 %v2278_v50  ;;  %v2288_v33 = vadd.f32 %v798_v20, %v700_v38  ;;  %v799_v10 = vsel %vm753_vm4, %v1978_v51, 0.0  ;;  %v380_v24 = vsel %vm334_vm5, %v1970_v31, 0.0  ;;  %vm492_vm7 = vcmp.eq.s32.totalorder %v2078_v56, %v1972_v34 }
  0x80   : > { %v701_v39 = vadd.f32 %v669_v30, %v569_v9  ;;  %v538_v12 = vsel %vm492_vm7, %v1980_v16, 0.0  ;;  %vm624_vm6 = vcmp.eq.s32.totalorder %v2078_v56, %v1982_v36  ;;  %vm754_vm8 = vcmp.eq.s32.totalorder %v2078_v56, %v1999_v52 }
  0x81   : > { %2741 = vst [vmem:[#allocation14_spill] sm:$0xff] %v2288_v33  ;;  %1002 = vmatpush.msra.mxu1 %v2288_v33  ;;  %v570_v20 = vadd.f32 %v538_v12, %v380_v24  ;;  %v670_v38 = vsel %vm624_vm6, %v1990_v37, 0.0  ;;  %v2302_v13 = vadd.s32 8, %v1730_v11  ;;  %v800_v9 = vsel %vm754_vm8, %v2014_v18, 0.0 }
  0x82   : > { %v2304_v63 = vadd.f32 %v799_v10, %v701_v39  ;;  %vm323_vm9 = vcmp.eq.s32.totalorder %v1730_v11, %v1798_v49  ;;  %vm481_vm10 = vcmp.eq.s32.totalorder %v1730_v11, %v1818_v61  ;;  %vm613_vm1 = vcmp.eq.s32.totalorder %v1730_v11, %v1814_v58 }
  0x83   : > { %v702_v30 = vadd.f32 %v670_v38, %v570_v20  ;;  %vm327_vm13 = vcmp.eq.s32.totalorder %v2302_v13, %v1798_v49  ;;  %vm485_vm14 = vcmp.eq.s32.totalorder %v2302_v13, %v1818_v61  ;;  %vm617_vm15 = vcmp.eq.s32.totalorder %v2302_v13, %v1814_v58 }
  0x84   : > { %2742 = vst [vmem:[#allocation15_spill] sm:$0xff] %v2304_v63  ;;  %1025 = vmatpush.msra.mxu2 %v2304_v63  ;;  %v373_v56 = vsel %vm327_vm13, %v1816_v60, 0.0  ;;  %v531_v10 = vsel %vm485_vm14, %v1830_v6, 0.0  ;;  %v663_v24 = vsel %vm617_vm15, %v1823_v1, 0.0  ;;  %vm747_vm2 = vcmp.eq.s32.totalorder %v2302_v13, %v1828_v4 }
  0x85   : > { %v2325_v39 = vadd.f32 %v800_v9, %v702_v30  ;;  %v563_v12 = vadd.f32 %v531_v10, %v373_v56  ;;  %v793_v20 = vsel %vm747_vm2, %v1838_v23, 0.0  ;;  %vm328_vm4 = vcmp.eq.s32.totalorder %v2302_v13, %v1835_v15 }
  0x86   : > { %v374_v38 = vsel %vm328_vm4, %v1840_v25, 0.0  ;;  %vm486_vm5 = vcmp.eq.s32.totalorder %v2302_v13, %v1844_v28  ;;  %vm618_vm7 = vcmp.eq.s32.totalorder %v2302_v13, %v1850_v32  ;;  %vm748_vm6 = vcmp.eq.s32.totalorder %v2302_v13, %v1871_v45 }
  0x87   : > { %2743 = vst [vmem:[#allocation16_spill] sm:$0xff] %v2325_v39  ;;  %1048 = vmatpush.msra.mxu3 %v2325_v39  ;;  %v695_v9 = vadd.f32 %v663_v24, %v563_v12  ;;  %v532_v30 = vsel %vm486_vm5, %v1846_v29, 0.0  ;;  %v664_v56 = vsel %vm618_vm7, %v1865_v41, 0.0  ;;  %v794_v10 = vsel %vm748_vm6, %v1873_v46, 0.0 }
  0x88   : > { %v564_v63 = vadd.f32 %v532_v30, %v374_v38  ;;  %vm329_vm8 = vcmp.eq.s32.totalorder %v2302_v13, %v1926_v42  ;;  %vm487_vm13 = vcmp.eq.s32.totalorder %v2302_v13, %v1950_v59  ;;  %vm619_vm14 = vcmp.eq.s32.totalorder %v2302_v13, %v1941_v53 }
  0x89   : > { %v2347_v33 = vadd.f32 %v793_v20, %v695_v9  ;;  %v375_v24 = vsel %vm329_vm8, %v1932_v48, 0.0  ;;  %v533_v12 = vsel %vm487_vm13, %v1968_v21, 0.0  ;;  %v665_v39 = vsel %vm619_vm14, %v1952_v62, 0.0 }
  0x8a   : > { %v696_v50 = vadd.f32 %v664_v56, %v564_v63  ;;  %v565_v19 = vadd.f32 %v533_v12, %v375_v24  ;;  %vm749_vm15 = vcmp.eq.s32.totalorder %v2302_v13, %v1957_v0  ;;  %vm330_vm2 = vcmp.eq.s32.totalorder %v2302_v13, %v1959_v2 }
  0x8b   : > { %980 = vmatpush.msra.mxu0 %v2347_v33  ;;  %v795_v20 = vsel %vm749_vm15, %v1978_v51, 0.0  ;;  %v376_v38 = vsel %vm330_vm2, %v1970_v31, 0.0  ;;  %vm488_vm4 = vcmp.eq.s32.totalorder %v2302_v13, %v1972_v34  ;;  %vm620_vm5 = vcmp.eq.s32.totalorder %v2302_v13, %v1982_v36 }
  0x8c   : > { %v2363_v63 = vadd.f32 %v794_v10, %v696_v50  ;;  %v697_v9 = vadd.f32 %v665_v39, %v565_v19  ;;  %v534_v30 = vsel %vm488_vm4, %v1980_v16, 0.0  ;;  %v666_v56 = vsel %vm620_vm5, %v1990_v37, 0.0 }
  0x8d   : > { %v566_v24 = vadd.f32 %v534_v30, %v376_v38  ;;  %vm750_vm7 = vcmp.eq.s32.totalorder %v2302_v13, %v1999_v52  ;;  %v369_v12 = vsel %vm323_vm9, %v1816_v60, 0.0  ;;  %v527_v50 = vsel %vm481_vm10, %v1830_v6, 0.0  ;;  %v1545_v30 = vld [vmem:[%s2405_s6 + $0x10] sm:$0xff] }
  0x8e   : > { %1003 = vmatpush.msra.mxu1 %v2363_v63  ;;  %v2379_v19 = vadd.f32 %v795_v20, %v697_v9  ;;  %v796_v39 = vsel %vm750_vm7, %v2014_v18, 0.0  ;;  %v559_v10 = vadd.f32 %v527_v50, %v369_v12  ;;  %v659_v38 = vsel %vm613_vm1, %v1823_v1, 0.0  ;;  %v2749_v9 = vld [vmem:[#allocation12_spill] sm:$0xff]  ;;  %v2757_v12 = vld [vmem:[#allocation2_spill] sm:$0xff] }
  0x8f   : > { %v698_v49 = vadd.f32 %v666_v56, %v566_v24  ;;  %vm743_vm9 = vcmp.eq.s32.totalorder %v1730_v11, %v1828_v4  ;;  %vm324_vm10 = vcmp.eq.s32.totalorder %v1730_v11, %v1835_v15  ;;  %vm482_vm6 = vcmp.eq.s32.totalorder %v1730_v11, %v1844_v28  ;;  %v2750_v56 = vld [vmem:[#allocation16_spill] sm:$0xff] }
  0x90   : > { %1026 = vmatpush.msra.mxu2 %v2379_v19  ;;  %v691_v60 = vadd.f32 %v659_v38, %v559_v10  ;;  %v789_v61 = vsel %vm743_vm9, %v1838_v23, 0.0  ;;  %v370_v6 = vsel %vm324_vm10, %v1840_v25, 0.0  ;;  %v528_v58 = vsel %vm482_vm6, %v1846_v29, 0.0 }
  0x91   : > { %v2396_v1 = vadd.f32 %v796_v39, %v698_v49  ;;  %v560_v20 = vadd.f32 %v528_v58, %v370_v6  ;;  %vm614_vm1 = vcmp.eq.s32.totalorder %v1730_v11, %v1850_v32  ;;  %vm744_vm8 = vcmp.eq.s32.totalorder %v1730_v11, %v1871_v45 }
  0x92   : > { %v2407_v4 = vadd.f32 %v789_v61, %v691_v60  ;;  %v660_v15 = vsel %vm614_vm1, %v1865_v41, 0.0  ;;  %v790_v23 = vsel %vm744_vm8, %v1873_v46, 0.0  ;;  %vm325_vm13 = vcmp.eq.s32.totalorder %v1730_v11, %v1926_v42  ;;  %v957_v41 = vld [vmem:[%s2405_s6] sm:$0xff] }
  0x93   : > { %1049 = vmatpush.msra.mxu3 %v2396_v1  ;;  %v692_v25 = vadd.f32 %v660_v15, %v560_v20  ;;  %v371_v28 = vsel %vm325_vm13, %v1932_v48, 0.0  ;;  %vm483_vm14 = vcmp.eq.s32.totalorder %v1730_v11, %v1950_v59  ;;  %vm615_vm15 = vcmp.eq.s32.totalorder %v1730_v11, %v1941_v53 }
  0x94   : > { %981 = vmatpush.msra.mxu0 %v2407_v4  ;;  %v529_v29 = vsel %vm483_vm14, %v1968_v21, 0.0  ;;  %v661_v32 = vsel %vm615_vm15, %v1952_v62, 0.0  ;;  %vm745_vm2 = vcmp.eq.s32.totalorder %v1730_v11, %v1957_v0  ;;  %vm326_vm4 = vcmp.eq.s32.totalorder %v1730_v11, %v1959_v2 }
  0x95   : > { %v2427_v45 = vadd.f32 %v790_v23, %v692_v25  ;;  %v561_v46 = vadd.f32 %v529_v29, %v371_v28  ;;  %v791_v42 = vsel %vm745_vm2, %v1978_v51, 0.0  ;;  %v372_v48 = vsel %vm326_vm4, %v1970_v31, 0.0  ;;  %v958_v51 = vld [vmem:[%s2405_s6 + $0x8] sm:$0xff] }
  0x96   : > { %1111 = vmatpush.msrb.mxu0 %v1869_v43  ;;  %vm484_vm5 = vcmp.eq.s32.totalorder %v1730_v11, %v1972_v34  ;;  %vm616_vm7 = vcmp.eq.s32.totalorder %v1730_v11, %v1982_v36  ;;  %vm746_vm9 = vcmp.eq.s32.totalorder %v1730_v11, %v1999_v52  ;;  %vm959_vm10 = vcmask 523264   ;;  %v2745_v36 = vld [vmem:[#allocation13_spill] sm:$0xff]  ;;  %v2747_v52 = vld [vmem:[#allocation14_spill] sm:$0xff]  ;;  %v2758_v23 = vld [vmem:[#allocation7_spill] sm:$0xff] }
  0x97   : > { %1004 = vmatpush.msra.mxu1 %v2427_v45  ;;  %v693_v53 = vadd.f32 %v661_v32, %v561_v46  ;;  %v530_v59 = vsel %vm484_vm5, %v1980_v16, 0.0  ;;  %v662_v62 = vsel %vm616_vm7, %v1990_v37, 0.0  ;;  %1537 = vmatmul.msk.f32.vlgmr.msra.gmra.mxu0 %vm959_vm10, %v957_v41  ;;  %v792_v21 = vsel %vm746_vm9, %v2014_v18, 0.0  ;;  %v2744_v16 = vld [vmem:[#allocation11_spill] sm:$0xff]  ;;  %v2746_v37 = vld [vmem:[#allocation10_spill] sm:$0xff]  ;;  %v2759_v32 = vld [vmem:[#allocation4_spill] sm:$0xff] }
  0x98   : > { %v562_v0 = vadd.f32 %v530_v59, %v372_v48  ;;  %1539 = vmatmul.msk.f32.vlgmr.msra.gmra.mxu1 %vm959_vm10, %v957_v41  ;;  %1112 = vmatpush.msrb.mxu0 %v2039_v35  ;;  %v2748_v18 = vld [vmem:[#allocation15_spill] sm:$0xff] }
  0x99   : > { %v2444_v2 = vadd.f32 %v791_v42, %v693_v53  ;;  %1134 = vmatpush.msrb.mxu1 %v1890_v57 }
  0x9a   : > { %v694_v31 = vadd.f32 %v662_v62, %v562_v0  ;;  %1113 = vmatpush.msrb.mxu0 %v2103_v3 }
  0x9b   : > { %1027 = vmatpush.msra.mxu2 %v2444_v2  ;;  %1135 = vmatpush.msrb.mxu1 %v2055_v26 }
  0x9c   : > { %v2451_v34 = vadd.f32 %v792_v21, %v694_v31  ;;  %1541 = vmatmul.msk.f32.vlgmr.msra.gmra.mxu2 %vm959_vm10, %v957_v41  ;;  %1114 = vmatpush.msrb.mxu0 %v2152_v5 }
  0x9d   : > { %1157 = vmatpush.msrb.mxu2 %v2012_v8  ;;  %1136 = vmatpush.msrb.mxu1 %v2115_v27 }
  0x9e   : > { %1050 = vmatpush.msra.mxu3 %v2451_v34  ;;  %1115 = vmatpush.msrb.mxu0 %v2218_v55 }
  0x9f   : > { %1543 = vmatmul.msk.f32.vlgmr.msra.gmra.mxu3 %vm959_vm10, %v957_v41  ;;  %1158 = vmatpush.msrb.mxu2 %v2069_v47 }
  0xa0   : > { %1180 = vmatpush.msrb.mxu3 %v2028_v44  ;;  %1137 = vmatpush.msrb.mxu1 %v2169_v40 }
  0xa1   : > { %1159 = vmatpush.msrb.mxu2 %v2125_v14  ;;  %1538 = vmatmul.msk.f32.gmra.mxu0 %vm959_vm10, %v958_v51 }
  0xa2   : > { %1181 = vmatpush.msrb.mxu3 %v2088_v7  ;;  %1540 = vmatmul.msk.f32.gmra.mxu1 %vm959_vm10, %v958_v51 }
  0xa3   : > { %1160 = vmatpush.msrb.mxu2 %v2191_v54  ;;  %1138 = vmatpush.msrb.mxu1 %v2228_v17 }
  0xa4   : > { %1182 = vmatpush.msrb.mxu3 %v2141_v22  ;;  %1542 = vmatmul.msk.f32.gmra.mxu2 %vm959_vm10, %v958_v51 }
  0xa5   : > { %1161 = vmatpush.msrb.mxu2 %v2744_v16  ;;  %1116 = vmatpush.msrb.mxu0 %v2745_v36 }
  0xa6   : > { %1183 = vmatpush.msrb.mxu3 %v2746_v37  ;;  %1139 = vmatpush.msrb.mxu1 %v2747_v52 }
  0xa7   : > { %1544 = vmatmul.msk.f32.gmra.mxu3 %vm959_vm10, %v958_v51  ;;  %1162 = vmatpush.msrb.mxu2 %v2748_v18 }
  0xa8   : > { %1184 = vmatpush.msrb.mxu3 %v2749_v9  ;;  %1117 = vmatpush.msrb.mxu0 %v2347_v33 }
  0xa9   : > { %1140 = vmatpush.msrb.mxu1 %v2363_v63  ;;  %1163 = vmatpush.msrb.mxu2 %v2379_v19 }
  0xaa   : > { %1185 = vmatpush.msrb.mxu3 %v2750_v56  ;;  %1118 = vmatpush.msrb.mxu0 %v2407_v4 }
  0xab   : > { %1141 = vmatpush.msrb.mxu1 %v2427_v45  ;;  %1164 = vmatpush.msrb.mxu2 %v2444_v2 }
  0xac   : > { %1186 = vmatpush.msrb.mxu3 %v2396_v1  ;;  %1547 = vmatmul.msk.f32.vlgmr.msrb.gmra.mxu0 %vm959_vm10, %v1545_v30 }
  0xad   : > { %1549 = vmatmul.msk.f32.vlgmr.msrb.gmra.mxu1 %vm959_vm10, %v1545_v30  ;;  %1551 = vmatmul.msk.f32.vlgmr.msrb.gmra.mxu2 %vm959_vm10, %v1545_v30 }
  0xae   : > { %1187 = vmatpush.msrb.mxu3 %v2451_v34  ;;  %1248 = vmatpush.msra.mxu0 %v1869_v43  ;;  %v1546_v43 = vld [vmem:[%s2405_s6 + $0x18] sm:$0xff] }
  0xaf   : > { %1553 = vmatmul.msk.f32.vlgmr.msrb.gmra.mxu3 %vm959_vm10, %v1545_v30  ;;  %1271 = vmatpush.msra.mxu1 %v1890_v57  ;;  %v1556_v57 = vld [vmem:[%s2405_s6 + $0x28] sm:$0xff] }
  0xb0   : > { %1317 = vmatpush.msra.mxu3 %v2028_v44  ;;  %1294 = vmatpush.msra.mxu2 %v2012_v8 }
  0xb1   : > { %1249 = vmatpush.msra.mxu0 %v2039_v35  ;;  %1272 = vmatpush.msra.mxu1 %v2055_v26  ;;  %v2751_v35 = vld [vmem:[#allocation3_spill] sm:$0xff]  ;;  %v2752_v26 = vld [vmem:[#allocation6_spill] sm:$0xff] }
  0xb2   : > { %1318 = vmatpush.msra.mxu3 %v2088_v7  ;;  %1295 = vmatpush.msra.mxu2 %v2069_v47  ;;  %vm853_vm6 = vcmp.lt.s32.totalorder %v2751_v35, 16  ;;  %vm863_vm1 = vcmp.lt.s32.totalorder %v2752_v26, 16  ;;  %v912_v39 = vperm.slane %v2752_v26, 6 }
  0xb3   : > { %1250 = vmatpush.msra.mxu0 %v2103_v3  ;;  %1273 = vmatpush.msra.mxu1 %v2115_v27  ;;  %vm855_vm8 = vmand %vm275_vm0, %vm853_vm6  ;;  %v2753_v3 = vmov 0.0  }
  0xb4   : > { %1319 = vmatpush.msra.mxu3 %v2141_v22  ;;  %1296 = vmatpush.msra.mxu2 %v2125_v14  ;;  %vm865_vm13 = vmand %vm435_vm3, %vm863_vm1  ;;  %v1533_v27 = vsel %vm855_vm8, 1.0, %v2753_v3  ;;  %v2754_v22 = vld [vmem:[#allocation8_spill] sm:$0xff]  ;;  %v916_v15 = vperm.slane %v912_v39, 2 }
  0xb5   : > { %1251 = vmatpush.msra.mxu0 %v2152_v5  ;;  %1274 = vmatpush.msra.mxu1 %v2169_v40  ;;  %v1535_v14 = vsel %vm865_vm13, 1.0, %v2753_v3  ;;  %vm854_vm14 = vcmp.lt.s32.totalorder %v2754_v22, 16  ;;  %v873_v40 = vperm.slane %v2751_v35, 2  ;;  %v875_v28 = vperm.slane %v2754_v22, 2 }
  0xb6   : > { %1320 = vmatpush.msra.mxu3 %v2746_v37  ;;  %1297 = vmatpush.msra.mxu2 %v2191_v54  ;;  %v911_v54 = vperm.slane %v2752_v26, 2  ;;  %v871_v50 = vmul.f32 %v1535_v14, %v2757_v12  ;;  %vm856_vm3 = vmand %vm276_vm11, %vm854_vm14  ;;  %vm924_vm4 = vcmp.eq.s32.totalorder %v2302_v13, %v916_v15  ;;  %vm920_vm7 = vcmp.eq.s32.totalorder %v1730_v11, %v916_v15 }
  0xb7   : > { %1548 = vmatmul.msk.f32.gmra.mxu0 %vm959_vm10, %v1546_v43  ;;  %1550 = vmatmul.msk.f32.gmra.mxu1 %vm959_vm10, %v1546_v43  ;;  %v877_v10 = vperm.slane %v873_v40, 2  ;;  %v1534_v49 = vsel %vm856_vm3, 1.0, %v2753_v3  ;;  %v879_v21 = vperm.slane %v875_v28, 2 }
  0xb8   : > { %1552 = vmatmul.msk.f32.gmra.mxu2 %vm959_vm10, %v1546_v43  ;;  %1554 = vmatmul.msk.f32.gmra.mxu3 %vm959_vm10, %v1546_v43  ;;  %v915_v38 = vperm.slane %v911_v54, 2  ;;  %v930_v61 = vperm.slane %v871_v50, 6  ;;  %v929_v20 = vperm.slane %v871_v50, 2  ;;  %v862_v25 = vmul.f32 %v1534_v49, %v2758_v23 }
  0xb9   : > { %1321 = vmatpush.msra.mxu3 %v2749_v9  ;;  %1252 = vmatpush.msra.mxu0 %v2218_v55  ;;  %v2755_v55 = vld [vmem:[#allocation9_spill] sm:$0xff]  ;;  %vm881_vm11 = vcmp.eq.s32.totalorder %v1730_v11, %v877_v10  ;;  %vm885_vm9 = vcmp.eq.s32.totalorder %v2302_v13, %v877_v10  ;;  %vm883_vm1 = vcmp.eq.s32.totalorder %v1730_v11, %v879_v21 }
  0xba   : > { %1275 = vmatpush.msra.mxu1 %v2228_v17  ;;  %1298 = vmatpush.msra.mxu2 %v2744_v16  ;;  %v1555_v17 = vld [vmem:[%s2405_s6 + $0x20] sm:$0xff]  ;;  %vm864_vm0 = vcmp.lt.s32.totalorder %v2755_v55, 16  ;;  %vm919_vm2 = vcmp.eq.s32.totalorder %v1730_v11, %v915_v38  ;;  %v938_v53 = vperm.slane %v930_v61, 2  ;;  %v913_v59 = vperm.slane %v2755_v55, 2 }
  0xbb   : > { %1322 = vmatpush.msra.mxu3 %v2750_v56  ;;  %1253 = vmatpush.msra.mxu0 %v2745_v36  ;;  %vm866_vm15 = vmand %vm436_vm12, %vm864_vm0  ;;  %v914_v62 = vperm.slane %v2755_v55, 6  ;;  %v894_v31 = vperm.slane %v862_v25, 6  ;;  %v893_v43 = vperm.slane %v862_v25, 2  ;;  %vm887_vm3 = vcmp.eq.s32.totalorder %v2302_v13, %v879_v21 }
  0xbc   : > { %1276 = vmatpush.msra.mxu1 %v2747_v52  ;;  %1299 = vmatpush.msra.mxu2 %v2748_v18  ;;  %v1536_v6 = vsel %vm866_vm15, 1.0, %v2753_v3  ;;  %v946_v51 = vsel %vm924_vm4, %v938_v53, 0.0  ;;  %v942_v52 = vsel %vm920_vm7, %v938_v53, 0.0  ;;  %v917_v18 = vperm.slane %v913_v59, 2 }
  0xbd   : > { %1323 = vmatpush.msra.mxu3 %v2396_v1  ;;  %1254 = vmatpush.msra.mxu0 %v2347_v33  ;;  %v872_v41 = vmul.f32 %v1536_v6, %v2759_v32  ;;  %v918_v9 = vperm.slane %v914_v62, 2  ;;  %v901_v50 = vperm.slane %v893_v43, 2 }
  0xbe   : > { %1277 = vmatpush.msra.mxu1 %v2363_v63  ;;  %1300 = vmatpush.msra.mxu2 %v2379_v19  ;;  %v2756_v63 = vld [vmem:[#allocation5_spill] sm:$0xff]  ;;  %v874_v19 = vperm.slane %v2751_v35, 6  ;;  %v902_v35 = vperm.slane %v894_v31, 2  ;;  %vm921_vm8 = vcmp.eq.s32.totalorder %v1730_v11, %v917_v18  ;;  %vm925_vm15 = vcmp.eq.s32.totalorder %v2302_v13, %v917_v18 }
  0xbf   : > { %1324 = vmatpush.msra.mxu3 %v2451_v34  ;;  %1255 = vmatpush.msra.mxu0 %v2407_v4  ;;  %v861_v24 = vmul.f32 %v1533_v27, %v2756_v63  ;;  %v932_v36 = vperm.slane %v872_v41, 6  ;;  %vm922_vm13 = vcmp.eq.s32.totalorder %v1730_v11, %v918_v9  ;;  %vm926_vm0 = vcmp.eq.s32.totalorder %v2302_v13, %v918_v9 }
  0xc0   : > { %1278 = vmatpush.msra.mxu1 %v2427_v45  ;;  %1301 = vmatpush.msra.mxu2 %v2444_v2  ;;  %v878_v4 = vperm.slane %v874_v19, 2  ;;  %v876_v45 = vperm.slane %v2754_v22, 6  ;;  %v937_v2 = vperm.slane %v929_v20, 2  ;;  %v909_v15 = vsel %vm887_vm3, %v901_v50, 0.0 }
  0xc1   : > { %1557 = vmatmul.msk.f32.vlgmr.msra.gmra.mxu0 %vm959_vm10, %v1555_v17  ;;  %1559 = vmatmul.msk.f32.vlgmr.msra.gmra.mxu1 %vm959_vm10, %v1555_v17  ;;  %v892_v60 = vperm.slane %v861_v24, 6  ;;  %v891_v1 = vperm.slane %v861_v24, 2  ;;  %v940_v22 = vperm.slane %v932_v36, 2 }
  0xc2   : > { %1561 = vmatmul.msk.f32.vlgmr.msra.gmra.mxu2 %vm959_vm10, %v1555_v17  ;;  %1563 = vmatmul.msk.f32.vlgmr.msra.gmra.mxu3 %vm959_vm10, %v1555_v17  ;;  %vm886_vm12 = vcmp.eq.s32.totalorder %v2302_v13, %v878_v4  ;;  %vm882_vm5 = vcmp.eq.s32.totalorder %v1730_v11, %v878_v4  ;;  %v880_v16 = vperm.slane %v876_v45, 2  ;;  %v941_v56 = vsel %vm919_vm2, %v937_v2, 0.0 }
  0xc3   : > { %v900_v48 = vperm.slane %v892_v60, 2  ;;  %v899_v0 = vperm.slane %v891_v1, 2  ;;  %v944_v49 = vsel %vm922_vm13, %v940_v22, 0.0  ;;  %v948_v61 = vsel %vm926_vm0, %v940_v22, 0.0 }
  0xc4   : > { %vm884_vm6 = vcmp.eq.s32.totalorder %v1730_v11, %v880_v16  ;;  %vm888_vm14 = vcmp.eq.s32.totalorder %v2302_v13, %v880_v16  ;;  %vm1373_vm2 = vcmask 1041408  }
  0xc5   : > { %v908_v34 = vsel %vm886_vm12, %v900_v48, 0.0  ;;  %v904_v37 = vsel %vm882_vm5, %v900_v48, 0.0  ;;  %v903_v30 = vsel %vm881_vm11, %v899_v0, 0.0  ;;  %v907_v26 = vsel %vm885_vm9, %v899_v0, 0.0 }
  0xc6   : > { %v2598_v17 = vadd.f32 %v946_v51, %v908_v34  ;;  %v2600_v14 = vadd.f32 %v942_v52, %v904_v37  ;;  %v2603_v54 = vadd.f32 %v941_v56, %v903_v30  ;;  %v906_v39 = vsel %vm884_vm6, %v902_v35, 0.0 }
  0xc7   : > { %v910_v60 = vsel %vm888_vm14, %v902_v35, 0.0  ;;  %v2633_v32 = vadd.f32 %v944_v49, %v906_v39  ;;  %vm1368_vm11 = vcmask 1040384   ;;  %vm1384_vm12 = vcmask 1043456  }
  0xc9   : > { %1558 = vmatmul.msk.f32.gmra.mxu0 %vm959_vm10, %v1556_v57  ;;  %1560 = vmatmul.msk.f32.gmra.mxu1 %vm959_vm10, %v1556_v57 }
  0xca   : > { %1562 = vmatmul.msk.f32.gmra.mxu2 %vm959_vm10, %v1556_v57  ;;  %1564 = vmatmul.msk.f32.gmra.mxu3 %vm959_vm10, %v1556_v57  ;;  %vm923_vm10 = vcmp.eq.s32.totalorder %v2302_v13, %v915_v38  ;;  %v931_v57 = vperm.slane %v872_v41, 2  ;;  %v2627_v13 = vadd.f32 %v948_v61, %v910_v60 }
  0xcb   : > { %v945_v3 = vsel %vm923_vm10, %v937_v2, 0.0 }
  0xcc   : > { %v2608_v55 = vadd.f32 %v945_v3, %v907_v26  ;;  %v939_v19 = vperm.slane %v931_v57, 2 }
  0xce   : > { %v947_v23 = vsel %vm925_vm15, %v939_v19, 0.0  ;;  %v943_v28 = vsel %vm921_vm8, %v939_v19, 0.0 }
 0x114   : > { %v2540_v8 = vpop.f32.mrf.mxu0 }
 0x115   : > { %v2542_v44 = vpop.f32.mrf.mxu1 }
 0x116   : > { %v1059_v38 = vmul.f32 %v2542_v44, %v2600_v14 }
 0x11e   : > { %v2552_v7 = vpop.f32.mrf.mxu0 }
 0x11f   : > { %v2550_v47 = vpop.f32.mrf.mxu2  ;;  %v2557_v5 = vpop.f32.mrf.mxu1  ;;  %v1062_v1 = vmul.f32 %v2552_v7, %v2608_v55 }
 0x120   : > { %v1063_v63 = vmul.f32 %v2557_v5, %v2598_v17  ;;  %v1058_v5 = vmul.f32 %v2540_v8, %v2603_v54  ;;  %v905_v8 = vsel %vm883_vm1, %v901_v50, 0.0 }
 0x121   : > { %v951_v62 = vadd.f32 %v943_v28, %v905_v8 }
 0x122   : > { %v2562_v33 = vpop.f32.mrf.mxu3  ;;  %v1073_v20 = vadd.f32 %v1063_v63, %v1059_v38  ;;  %v1066_v45 = vadd.f32 %v1062_v1, %v1058_v5 }
 0x123   : > { %v1061_v11 = vmul.f32 %v2562_v33, %v2633_v32  ;;  %v1060_v30 = vmul.f32 %v2550_v47, %v951_v62 }
 0x124   : > { %v1067_v51 = vrot.slane %v1066_v45, 4 }
 0x126   : > { %v1068_v43 = vadd.f32 %v1067_v51, %v1066_v45 }
 0x127   : > { %v2574_v58 = vpop.f32.mrf.mxu2 }
 0x128   : > { %v1069_v39 = vrot.slane %v1068_v43, 2 }
 0x129   : > { %v2580_v29 = vpop.f32.mrf.mxu0 }
 0x12a   : > { %v2586_v46 = vpop.f32.mrf.mxu3  ;;  %v1143_v42 = vpop.f32.mrf.mxu1  ;;  %v1195_v4 = vmul.f32 %v2580_v29, %v2603_v54  ;;  %v955_v29 = vadd.f32 %v947_v23, %v909_v15 }
 0x12b   : > { %v1196_v6 = vmul.f32 %v1143_v42, %v2600_v14  ;;  %v1074_v42 = vrot.slane %v1073_v20, 4  ;;  %v1065_v0 = vmul.f32 %v2586_v46, %v2627_v13 }
 0x12c   : > { %v1064_v36 = vmul.f32 %v2574_v58, %v955_v29 }
 0x12d   : > { %v1075_v16 = vadd.f32 %v1074_v42, %v1073_v20  ;;  %v1087_v56 = vadd.f32 %v1065_v0, %v1061_v11 }
 0x12e   : > { %v1080_v35 = vadd.f32 %v1064_v36, %v1060_v30 }
 0x12f   : > { %v1076_v57 = vrot.slane %v1075_v16, 2 }
 0x130   : > { %v1166_v27 = vpop.f32.mrf.mxu2  ;;  %v1081_v38 = vrot.slane %v1080_v35, 4 }
 0x131   : > { %v1197_v52 = vmul.f32 %v1166_v27, %v951_v62 }
 0x132   : > { %v1189_v40 = vpop.f32.mrf.mxu3 }
 0x133   : > { %v1198_v31 = vmul.f32 %v1189_v40, %v2633_v32 }
 0x134   : > { %v1123_v24 = vpop.f32.mrf.mxu0  ;;  %v1146_v12 = vpop.f32.mrf.mxu1 }
 0x135   : > { %v1200_v10 = vmul.f32 %v1146_v12, %v2598_v17  ;;  %v1199_v44 = vmul.f32 %v1123_v24, %v2608_v55  ;;  %v1088_v24 = vrot.slane %v1087_v56, 4 }
 0x137   : > { %v1210_v25 = vadd.f32 %v1200_v10, %v1196_v6  ;;  %v1203_v48 = vadd.f32 %v1199_v44, %v1195_v4  ;;  %v1077_v10 = vadd.f32 %v1076_v57, %v1075_v16  ;;  %v1089_v6 = vadd.f32 %v1088_v24, %v1087_v56 }
 0x138   : > { %v1070_v44 = vadd.f32 %v1069_v39, %v1068_v43 }
 0x139   : > { %v1211_v53 = vrot.slane %v1210_v25, 4  ;;  %v1204_v37 = vrot.slane %v1203_v48, 4  ;;  %v1078_v15 = vrot.slane %v1077_v10, 1 }
 0x13b   : > { %v1169_v7 = vpop.f32.mrf.mxu2  ;;  %v1192_v41 = vpop.f32.mrf.mxu3  ;;  %v1212_v18 = vadd.f32 %v1211_v53, %v1210_v25  ;;  %v1205_v26 = vadd.f32 %v1204_v37, %v1203_v48  ;;  %v1090_v53 = vrot.slane %v1089_v6, 2 }
 0x13c   : > { %v1202_v59 = vmul.f32 %v1192_v41, %v2627_v13  ;;  %v1201_v34 = vmul.f32 %v1169_v7, %v955_v29 }
 0x13d   : > { %v1213_v33 = vrot.slane %v1212_v18, 2  ;;  %v1206_v49 = vrot.slane %v1205_v26, 2 }
 0x13e   : > { %v1257_v2 = vpop.f32.mrf.mxu0  ;;  %v1280_v21 = vpop.f32.mrf.mxu1  ;;  %v1224_v9 = vadd.f32 %v1202_v59, %v1198_v31  ;;  %v1217_v46 = vadd.f32 %v1201_v34, %v1197_v52  ;;  %v1079_v52 = vadd.f32 %v1078_v15, %v1077_v10 }
 0x13f   : > { %v1332_v22 = vmul.f32 %v1257_v2, %v2603_v54  ;;  %v1333_v50 = vmul.f32 %v1280_v21, %v2600_v14  ;;  %v1214_v5 = vadd.f32 %v1213_v33, %v1212_v18  ;;  %v1082_v14 = vadd.f32 %v1081_v38, %v1080_v35 }
 0x140   : > { %v1225_v3 = vrot.slane %v1224_v9, 4  ;;  %v1218_v27 = vrot.slane %v1217_v46, 4  ;;  %v1207_v23 = vadd.f32 %v1206_v49, %v1205_v26  ;;  %v1071_v21 = vrot.slane %v1070_v44, 1 }
 0x141   : > { %v1083_v51 = vrot.slane %v1082_v14, 2 }
 0x142   : > { %v1226_v60 = vadd.f32 %v1225_v3, %v1224_v9  ;;  %v1219_v1 = vadd.f32 %v1218_v27, %v1217_v46  ;;  %v1208_v11 = vrot.slane %v1207_v23, 1  ;;  %v1072_v3 = vadd.f32 %v1071_v21, %v1070_v44 }
 0x143   : > { %v1084_v57 = vadd.f32 %v1083_v51, %v1082_v14 }
 0x144   : > { %v1227_v25 = vrot.slane %v1226_v60, 2  ;;  %v1220_v59 = vrot.slane %v1219_v1, 2  ;;  %v1209_v56 = vadd.f32 %v1208_v11, %v1207_v23 }
 0x145   : > { %v1303_v40 = vpop.f32.mrf.mxu2  ;;  %v1326_v63 = vpop.f32.mrf.mxu3  ;;  %v1085_v39 = vrot.slane %v1084_v57, 1 }
 0x146   : > { %v1260_v58 = vpop.f32.mrf.mxu0  ;;  %v1283_v12 = vpop.f32.mrf.mxu1  ;;  %v1334_v41 = vmul.f32 %v1303_v40, %v951_v62  ;;  %v1335_v45 = vmul.f32 %v1326_v63, %v2633_v32  ;;  %v1228_v16 = vadd.f32 %v1227_v25, %v1226_v60  ;;  %v1091_v32 = vadd.f32 %v1090_v53, %v1089_v6  ;;  %v1614_v6 = vld [vmem:[%s1722_s29] sm:$0x77] }
 0x147   : > { %v1336_v47 = vmul.f32 %v1260_v58, %v2608_v55  ;;  %v1337_v19 = vmul.f32 %v1283_v12, %v2598_v17  ;;  %v1215_v55 = vrot.slane %v1214_v5, 1  ;;  %v1369_v27 = vsel %vm1368_vm11, %v1072_v3, %v1209_v56 }
 0x148   : > { %v1229_v35 = vrot.slane %v1228_v16, 1  ;;  %v1092_v24 = vrot.slane %v1091_v32, 1  ;;  %v1086_v44 = vadd.f32 %v1085_v39, %v1084_v57 }
 0x149   : > { %v1340_v61 = vadd.f32 %v1336_v47, %v1332_v22  ;;  %v1347_v54 = vadd.f32 %v1337_v19, %v1333_v50  ;;  %v1216_v18 = vadd.f32 %v1215_v55, %v1214_v5 }
 0x14a   : > { %v1230_v10 = vadd.f32 %v1229_v35, %v1228_v16 }
 0x14b   : > { %v1341_v20 = vrot.slane %v1340_v61, 4  ;;  %v1348_v4 = vrot.slane %v1347_v54, 4  ;;  %v1370_v22 = vsel %vm1368_vm11, %v1079_v52, %v1216_v18 }
 0x14d   : > { %v1342_v17 = vadd.f32 %v1341_v20, %v1340_v61  ;;  %v1349_v8 = vadd.f32 %v1348_v4, %v1347_v54  ;;  %v1306_v28 = vpop.f32.mrf.mxu2  ;;  %v1329_v7 = vpop.f32.mrf.mxu3  ;;  %v1093_v61 = vadd.f32 %v1092_v24, %v1091_v32 }
 0x14e   : > { %v1338_v42 = vmul.f32 %v1306_v28, %v955_v29  ;;  %v1339_v48 = vmul.f32 %v1329_v7, %v2627_v13  ;;  %v1221_v29 = vadd.f32 %v1220_v59, %v1219_v1 }
 0x14f   : > { %v1343_v0 = vrot.slane %v1342_v17, 2  ;;  %v1350_v2 = vrot.slane %v1349_v8, 2  ;;  %v1372_v15 = vsel %vm1368_vm11, %v1093_v61, %v1230_v10 }
 0x150   : > { %v1354_v31 = vadd.f32 %v1338_v42, %v1334_v41  ;;  %v1361_v34 = vadd.f32 %v1339_v48, %v1335_v45  ;;  %v1222_v58 = vrot.slane %v1221_v29, 1 }
 0x151   : > { %v1344_v36 = vadd.f32 %v1343_v0, %v1342_v17  ;;  %v1351_v37 = vadd.f32 %v1350_v2, %v1349_v8  ;;  %v1615_v8 = vld [vmem:[%s1722_s29 + $0x8] sm:$0x77] }
 0x152   : > { %v1355_v62 = vrot.slane %v1354_v31, 4  ;;  %v1362_v9 = vrot.slane %v1361_v34, 4  ;;  %v1223_v54 = vadd.f32 %v1222_v58, %v1221_v29 }
 0x153   : > { %v1345_v30 = vrot.slane %v1344_v36, 1  ;;  %v1352_v13 = vrot.slane %v1351_v37, 1 }
 0x154   : > { %v1356_v46 = vadd.f32 %v1355_v62, %v1354_v31  ;;  %v1363_v43 = vadd.f32 %v1362_v9, %v1361_v34  ;;  %v1371_v23 = vsel %vm1368_vm11, %v1086_v44, %v1223_v54 }
 0x155   : > { %v1346_v26 = vadd.f32 %v1345_v30, %v1344_v36  ;;  %v1353_v33 = vadd.f32 %v1352_v13, %v1351_v37 }
 0x156   : > { %v1357_v40 = vrot.slane %v1356_v46, 2  ;;  %v1364_v63 = vrot.slane %v1363_v43, 2 }
 0x157   : > { %v1375_v12 = vsel %vm1373_vm2, %v1370_v22, %v1353_v33  ;;  %v1374_v38 = vsel %vm1373_vm2, %v1369_v27, %v1346_v26 }
 0x158   : > { %v1382_v50 = vrot.slane %v1375_v12, 4  ;;  %v1358_v47 = vadd.f32 %v1357_v40, %v1356_v46  ;;  %v1365_v19 = vadd.f32 %v1364_v63, %v1363_v43 }
 0x15a   : > { %v1385_v49 = vsel %vm1384_vm12, %v1374_v38, %v1382_v50  ;;  %v1359_v5 = vrot.slane %v1358_v47, 1  ;;  %v1366_v60 = vrot.slane %v1365_v19, 1 }
 0x15b   : > { %v1389_v1 = vadd.f32 %v1614_v6, %v1385_v49 }
 0x15c   : > { %v1360_v20 = vadd.f32 %v1359_v5, %v1358_v47  ;;  %v1367_v4 = vadd.f32 %v1366_v60, %v1365_v19 }
 0x15d   : > { %1391 = vst [vmem:[%s250_s9] sm:$0x77] %v1389_v1 }
 0x15e   : > { %v1377_v14 = vsel %vm1373_vm2, %v1372_v15, %v1367_v4  ;;  %v1376_v25 = vsel %vm1373_vm2, %v1371_v23, %v1360_v20 }
 0x15f   : > { %v1383_v55 = vrot.slane %v1377_v14, 4 }
 0x161   : > { %v1386_v17 = vsel %vm1384_vm12, %v1376_v25, %v1383_v55 }
 0x162   : > { %v1390_v28 = vadd.f32 %v1615_v8, %v1386_v17 }
 0x164   : > { %1392 = vst [vmem:[%s250_s9 + $0x8] sm:$0x77] %v1390_v28 }
 0x165 PF: > { %s13_s16 = sadd.s32 1, %s1654_s16   ;;  %s2760_s12 = smov %s1646_s14 }
 0x166   : > { %p10_p7 = scmp.ge.s32.totalorder %s13_s16, 6   ;;  %s2761_s13 = smov %s1650_s15 }
 0x167   : > { %s2762_s14 = smov %s2765_s17  ;;  %s2763_s15 = smov %s2769_s18 }
 0x168   :  { %12 = sbr.rel (!%p10_p7) target bundleno = 3 (0x3), region = 70 }

</bundles_post_ra>
